<compile_context>
chip_gen: v6e
topology: v6e:2x2x1
jax: 0.10.0
libtpu: 0.0.40
codegen_flags: <defaults>
</compile_context>

<pallas_src>
import math
import jax
import jax.numpy as jnp
from jax.experimental import pallas as pl
from jax.experimental.pallas import tpu as pltpu

# ---------------- model config (small, consistent with the module) ----------------
B = 2          # batch
S = 16         # seq length (height * width)
D_MODEL = 32   # d_model
N_HEADS = 4    # n_heads
D_HEAD = 8     # d_head
D_ATTN = N_HEADS * D_HEAD      # 32
N_COND = 8     # conditional sequence length
D_COND = 24    # d_cond
D_MULT = 4
D_FF = D_MODEL * D_MULT        # 128
SCALE = D_HEAD ** (-0.5)
LN_EPS = 1e-5
SQRT2 = math.sqrt(2.0)


def transformer_block_kernel(
    x_ref, cond_ref,
    # norm1 + attn1 (self-attention; per-head fused q|k|v, scale folded into q)
    g1_ref, b1_ref, wqkv1_ref, wo1_ref, bo1_ref,
    # norm2 + attn2 (cross-attention; per-head q (scaled) and fused k|v)
    g2_ref, b2_ref, wq2_ref, wkv2_ref, wo2_ref, bo2_ref,
    # norm3 + feed-forward (GeGLU)
    g3_ref, b3_ref, wg_ref, bg_ref, wf_ref, bf_ref,
    o_ref,
):
    bb = x_ref.shape[0]                               # batch elements this grid step
    x = x_ref[...].reshape(bb * S, D_MODEL)           # (rows, D_MODEL)
    cond = cond_ref[...].reshape(bb * N_COND, D_COND)  # (rows_kv, D_COND)

    def layernorm(h, g_ref, b_ref):
        # single-pass statistics: var = E[h^2] - mu^2 (one XLU reduce pass)
        mu = jnp.mean(h, axis=-1, keepdims=True)
        ms = jnp.mean(h * h, axis=-1, keepdims=True)
        var = ms - mu * mu
        return (h - mu) * jax.lax.rsqrt(var + LN_EPS) * g_ref[...] + b_ref[...]

    def attend(qh, kh, vh, wo_ref, bo_ref):
        # qh: (H, bb*S, Dh); kh/vh: (H, bb*Lkv, Dh)  -- head-major, scale in q.
        kv_rows = kh.shape[1] // bb
        # Regroup so every batch slice is a single (head, batch-elem) pair.
        # These reshapes only split/merge leading (major) dims at sublane-tile
        # boundaries, so they are layout relabels (no cross-lane movement).
        qh = qh.reshape(N_HEADS * bb, S, D_HEAD)
        kh = kh.reshape(N_HEADS * bb, kv_rows, D_HEAD)
        vh = vh.reshape(N_HEADS * bb, kv_rows, D_HEAD)
        s = jnp.einsum('hqd,hkd->hqk', qh, kh,
                       preferred_element_type=jnp.float32)
        s = s - jnp.max(s, axis=-1, keepdims=True)
        p = jnp.exp(s)
        # reciprocal-multiply on the EUP instead of a VALU divide
        p = p * pl.reciprocal(jnp.sum(p, axis=-1, keepdims=True), approx=True)
        o = jnp.einsum('hqk,hkd->hqd', p, vh,
                       preferred_element_type=jnp.float32)     # (H*bb, S, Dh)
        o = o.reshape(N_HEADS, bb * S, D_HEAD)
        # per-head output projection summed over heads == concat-then-matmul
        out = jnp.einsum('hrd,hdm->hrm', o, wo_ref[...],
                         preferred_element_type=jnp.float32)   # (H, rows, D_MODEL)
        return jnp.sum(out, axis=0) + bo_ref[...]              # (rows, D_MODEL)

    # ---- x = attn1(norm1(x)) + x   (self-attention; cond falls back to x) ----
    h = layernorm(x, g1_ref, b1_ref)
    hb = jnp.broadcast_to(h, (N_HEADS,) + h.shape)             # (H, rows, D_MODEL)
    qkv = jnp.einsum('hrd,hdf->hrf', hb, wqkv1_ref[...],
                     preferred_element_type=jnp.float32)       # (H, rows, 3*Dh)
    x = attend(qkv[..., :D_HEAD],
               qkv[..., D_HEAD:2 * D_HEAD],
               qkv[..., 2 * D_HEAD:],
               wo1_ref, bo1_ref) + x

    # ---- x = attn2(norm2(x), cond) + x   (cross-attention) ----
    h = layernorm(x, g2_ref, b2_ref)
    hb = jnp.broadcast_to(h, (N_HEADS,) + h.shape)
    q = jnp.einsum('hrd,hdf->hrf', hb, wq2_ref[...],
                   preferred_element_type=jnp.float32)         # (H, rows, Dh)
    cb = jnp.broadcast_to(cond, (N_HEADS,) + cond.shape)       # (H, rows_kv, D_COND)
    kv = jnp.einsum('hrd,hdf->hrf', cb, wkv2_ref[...],
                    preferred_element_type=jnp.float32)        # (H, rows_kv, 2*Dh)
    x = attend(q, kv[..., :D_HEAD], kv[..., D_HEAD:], wo2_ref, bo2_ref) + x

    # ---- x = ff(norm3(x)) + x   (GeGLU -> Dropout(0.0) no-op -> Linear) ----
    h = layernorm(x, g3_ref, b3_ref)
    proj = jnp.dot(h, wg_ref[...], preferred_element_type=jnp.float32) + bg_ref[...]
    a = proj[:, :D_FF]
    gate = proj[:, D_FF:]
    gelu_gate = 0.5 * gate * (1.0 + jax.lax.erf(gate / SQRT2))   # exact erf GELU
    ff = jnp.dot(a * gelu_gate, wf_ref[...],
                 preferred_element_type=jnp.float32) + bf_ref[...]
    o_ref[...] = (ff + x).reshape(bb, S, D_MODEL)


def _batch_block() -> int:
    """v7x has 2 TensorCores/chip: keep batch on a parallel grid so both cores
    get work.  v5e/v6e are single-TC: collapse the batch into one grid step to
    amortize the ~0.35us per-step pipeline overhead (work per step is tiny)."""
    try:
        kind = jax.devices()[0].device_kind.lower()
    except Exception:
        kind = ""
    if "v7" in kind or "7x" in kind:
        return 1
    return B


def pack_params(params):
    """Wrapper-side (free) weight packing: per-head fused QKV / KV, scale folded
    into Q, output projection reshaped to head-major."""
    (g1, b1, wq1, wk1, wv1, wo1, bo1,
     g2, b2, wq2, wk2, wv2, wo2, bo2,
     g3, b3, wg, bg, wf, bf) = params

    def per_head_in(w):   # (d_in, H*Dh) -> (H, d_in, Dh)
        d_in = w.shape[0]
        return jnp.transpose(w.reshape(d_in, N_HEADS, D_HEAD), (1, 0, 2))

    def per_head_out(w):  # (H*Dh, d_out) -> (H, Dh, d_out)
        return w.reshape(N_HEADS, D_HEAD, w.shape[1])

    wqkv1 = jnp.concatenate(
        [per_head_in(wq1 * SCALE), per_head_in(wk1), per_head_in(wv1)],
        axis=-1)                                   # (H, D_MODEL, 3*Dh)
    wo1_h = per_head_out(wo1)                      # (H, Dh, D_MODEL)
    wq2_h = per_head_in(wq2 * SCALE)               # (H, D_MODEL, Dh)
    wkv2 = jnp.concatenate([per_head_in(wk2), per_head_in(wv2)],
                           axis=-1)                # (H, D_COND, 2*Dh)
    wo2_h = per_head_out(wo2)                      # (H, Dh, D_MODEL)

    return [g1, b1, wqkv1, wo1_h, bo1,
            g2, b2, wq2_h, wkv2, wo2_h, bo2,
            g3, b3, wg, bg, wf, bf]


def basic_transformer_block(x, cond, packed_params, *, batch_block=None):
    """x: (B, S, D_MODEL) f32; cond: (B, N_COND, D_COND) f32."""
    bb = _batch_block() if batch_block is None else batch_block
    assert B % bb == 0

    def full(p):
        nd = p.ndim
        return pl.BlockSpec(p.shape, lambda b, _nd=nd: (0,) * _nd)

    in_specs = [
        pl.BlockSpec((bb, S, D_MODEL), lambda b: (b, 0, 0)),      # x
        pl.BlockSpec((bb, N_COND, D_COND), lambda b: (b, 0, 0)),  # cond
    ] + [full(p) for p in packed_params]

    return pl.pallas_call(
        transformer_block_kernel,
        out_shape=jax.ShapeDtypeStruct((B, S, D_MODEL), jnp.float32),
        grid_spec=pltpu.PrefetchScalarGridSpec(
            num_scalar_prefetch=0,
            grid=(B // bb,),
            in_specs=in_specs,
            out_specs=pl.BlockSpec((bb, S, D_MODEL), lambda b: (b, 0, 0)),
        ),
        compiler_params=pltpu.CompilerParams(
            dimension_semantics=("parallel",)),
    )(x, cond, *packed_params)


def init_params(key):
    """Deterministic synthetic parameters. Weights stored as (in, out)."""
    ks = iter(jax.random.split(key, 32))
    nrm = lambda shape, s=0.05: (s * jax.random.normal(next(ks), shape)).astype(jnp.float32)

    def ln_params():
        g = (1.0 + 0.01 * jax.random.normal(next(ks), (1, D_MODEL))).astype(jnp.float32)
        b = nrm((1, D_MODEL), 0.01)
        return g, b

    g1, b1 = ln_params()
    wq1 = nrm((D_MODEL, D_ATTN)); wk1 = nrm((D_MODEL, D_ATTN)); wv1 = nrm((D_MODEL, D_ATTN))
    wo1 = nrm((D_ATTN, D_MODEL)); bo1 = nrm((1, D_MODEL), 0.01)
    g2, b2 = ln_params()
    wq2 = nrm((D_MODEL, D_ATTN)); wk2 = nrm((D_COND, D_ATTN)); wv2 = nrm((D_COND, D_ATTN))
    wo2 = nrm((D_ATTN, D_MODEL)); bo2 = nrm((1, D_MODEL), 0.01)
    g3, b3 = ln_params()
    wg = nrm((D_MODEL, 2 * D_FF)); bg = nrm((1, 2 * D_FF), 0.01)
    wf = nrm((D_FF, D_MODEL)); bf = nrm((1, D_MODEL), 0.01)

    return [g1, b1, wq1, wk1, wv1, wo1, bo1,
            g2, b2, wq2, wk2, wv2, wo2, bo2,
            g3, b3, wg, bg, wf, bf]


def reference_block(x, cond, params):
    """Pure-JAX reference matching the PyTorch module's forward."""
    (g1, b1, wq1, wk1, wv1, wo1, bo1,
     g2, b2, wq2, wk2, wv2, wo2, bo2,
     g3, b3, wg, bg, wf, bf) = params

    def ln(h, g, b):
        mu = jnp.mean(h, axis=-1, keepdims=True)
        var = jnp.mean((h - mu) ** 2, axis=-1, keepdims=True)
        return (h - mu) / jnp.sqrt(var + LN_EPS) * g + b

    def attn(h, ctx, wq, wk, wv, wo, bo):
        q = (h @ wq).reshape(h.shape[0], h.shape[1], N_HEADS, D_HEAD)
        k = (ctx @ wk).reshape(ctx.shape[0], ctx.shape[1], N_HEADS, D_HEAD)
        v = (ctx @ wv).reshape(ctx.shape[0], ctx.shape[1], N_HEADS, D_HEAD)
        s = jnp.einsum('bihd,bjhd->bhij', q, k) * SCALE
        p = jax.nn.softmax(s, axis=-1)
        o = jnp.einsum('bhij,bjhd->bihd', p, v).reshape(h.shape[0], h.shape[1], D_ATTN)
        return o @ wo + bo

    h = ln(x, g1, b1); x = attn(h, h, wq1, wk1, wv1, wo1, bo1) + x
    h = ln(x, g2, b2); x = attn(h, cond, wq2, wk2, wv2, wo2, bo2) + x
    h = ln(x, g3, b3)
    proj = h @ wg + bg
    a, gate = proj[..., :D_FF], proj[..., D_FF:]
    ff = (a * jax.nn.gelu(gate, approximate=False)) @ wf + bf
    return ff + x


if __name__ == "__main__":
    key = jax.random.PRNGKey(0)
    kx, kc, kp = jax.random.split(key, 3)
    x = jax.random.normal(kx, (B, S, D_MODEL), dtype=jnp.float32)
    cond = jax.random.normal(kc, (B, N_COND, D_COND), dtype=jnp.float32)
    params = init_params(kp)
    packed = pack_params(params)

    out = basic_transformer_block(x, cond, packed)
    out = jax.block_until_ready(out)
    assert out.shape == (B, S, D_MODEL), out.shape
    assert bool(jnp.all(jnp.isfinite(out)))

    ref = reference_block(x, cond, params)
    assert bool(jnp.allclose(out, ref, atol=2e-2, rtol=2e-2)), float(
        jnp.max(jnp.abs(out - ref)))
    print("KERNEL_OK")
</pallas_src>

<mosaic_0001>
module attributes {stable_mosaic.version = 11 : i64} {
  func.func @transformer_block_kernel(%arg0: i32, %arg1: memref<2x16x32xf32, #tpu.memory_space<vmem>>, %arg2: memref<2x8x24xf32, #tpu.memory_space<vmem>>, %arg3: memref<1x32xf32, #tpu.memory_space<vmem>>, %arg4: memref<1x32xf32, #tpu.memory_space<vmem>>, %arg5: memref<4x32x24xf32, #tpu.memory_space<vmem>>, %arg6: memref<4x8x32xf32, #tpu.memory_space<vmem>>, %arg7: memref<1x32xf32, #tpu.memory_space<vmem>>, %arg8: memref<1x32xf32, #tpu.memory_space<vmem>>, %arg9: memref<1x32xf32, #tpu.memory_space<vmem>>, %arg10: memref<4x32x8xf32, #tpu.memory_space<vmem>>, %arg11: memref<4x24x16xf32, #tpu.memory_space<vmem>>, %arg12: memref<4x8x32xf32, #tpu.memory_space<vmem>>, %arg13: memref<1x32xf32, #tpu.memory_space<vmem>>, %arg14: memref<1x32xf32, #tpu.memory_space<vmem>>, %arg15: memref<1x32xf32, #tpu.memory_space<vmem>>, %arg16: memref<32x256xf32, #tpu.memory_space<vmem>>, %arg17: memref<1x256xf32, #tpu.memory_space<vmem>>, %arg18: memref<128x32xf32, #tpu.memory_space<vmem>>, %arg19: memref<1x32xf32, #tpu.memory_space<vmem>>, %arg20: memref<2x16x32xf32, #tpu.memory_space<vmem>>) attributes {dimension_semantics = [#tpu.dimension_semantics<parallel>], iteration_bounds = array<i64: 1>, scalar_prefetch = 0 : i64, scratch_operands = 0 : i64, tpu.core_type = #tpu.core_type<tc>, window_params = [{transform_indices = @transform_0, window_bounds = array<i64: 2, 16, 32>}, {transform_indices = @transform_1, window_bounds = array<i64: 2, 8, 24>}, {pipeline_mode = #tpu.pipeline_mode<synchronous>, transform_indices = @transform_2, window_bounds = array<i64: 1, 32>}, {pipeline_mode = #tpu.pipeline_mode<synchronous>, transform_indices = @transform_3, window_bounds = array<i64: 1, 32>}, {pipeline_mode = #tpu.pipeline_mode<synchronous>, transform_indices = @transform_4, window_bounds = array<i64: 4, 32, 24>}, {pipeline_mode = #tpu.pipeline_mode<synchronous>, transform_indices = @transform_5, window_bounds = array<i64: 4, 8, 32>}, {pipeline_mode = #tpu.pipeline_mode<synchronous>, transform_indices = @transform_6, window_bounds = array<i64: 1, 32>}, {pipeline_mode = #tpu.pipeline_mode<synchronous>, transform_indices = @transform_7, window_bounds = array<i64: 1, 32>}, {pipeline_mode = #tpu.pipeline_mode<synchronous>, transform_indices = @transform_8, window_bounds = array<i64: 1, 32>}, {pipeline_mode = #tpu.pipeline_mode<synchronous>, transform_indices = @transform_9, window_bounds = array<i64: 4, 32, 8>}, {pipeline_mode = #tpu.pipeline_mode<synchronous>, transform_indices = @transform_10, window_bounds = array<i64: 4, 24, 16>}, {pipeline_mode = #tpu.pipeline_mode<synchronous>, transform_indices = @transform_11, window_bounds = array<i64: 4, 8, 32>}, {pipeline_mode = #tpu.pipeline_mode<synchronous>, transform_indices = @transform_12, window_bounds = array<i64: 1, 32>}, {pipeline_mode = #tpu.pipeline_mode<synchronous>, transform_indices = @transform_13, window_bounds = array<i64: 1, 32>}, {pipeline_mode = #tpu.pipeline_mode<synchronous>, transform_indices = @transform_14, window_bounds = array<i64: 1, 32>}, {pipeline_mode = #tpu.pipeline_mode<synchronous>, transform_indices = @transform_15, window_bounds = array<i64: 32, 256>}, {pipeline_mode = #tpu.pipeline_mode<synchronous>, transform_indices = @transform_16, window_bounds = array<i64: 1, 256>}, {pipeline_mode = #tpu.pipeline_mode<synchronous>, transform_indices = @transform_17, window_bounds = array<i64: 128, 32>}, {pipeline_mode = #tpu.pipeline_mode<synchronous>, transform_indices = @transform_18, window_bounds = array<i64: 1, 32>}, {transform_indices = @transform_19, window_bounds = array<i64: 2, 16, 32>}]} {
    %c0 = arith.constant 0 : index
    %c0_0 = arith.constant 0 : index
    %c0_1 = arith.constant 0 : index
    %0 = vector.load %arg1[%c0, %c0_0, %c0_1] : memref<2x16x32xf32, #tpu.memory_space<vmem>>, vector<2x16x32xf32>
    %1 = vector.shape_cast %0 : vector<2x16x32xf32> to vector<32x32xf32>
    %c0_2 = arith.constant 0 : index
    %c0_3 = arith.constant 0 : index
    %c0_4 = arith.constant 0 : index
    %2 = vector.load %arg2[%c0_2, %c0_3, %c0_4] : memref<2x8x24xf32, #tpu.memory_space<vmem>>, vector<2x8x24xf32>
    %3 = vector.shape_cast %2 : vector<2x8x24xf32> to vector<16x24xf32>
    %cst = arith.constant dense<0.000000e+00> : vector<32xf32>
    %4 = vector.multi_reduction <add>, %1, %cst [1] : vector<32x32xf32> to vector<32xf32>
    %5 = vector.shape_cast %4 : vector<32xf32> to vector<32x1xf32>
    %cst_5 = arith.constant 3.200000e+01 : f32
    %6 = vector.broadcast %cst_5 : f32 to vector<32x1xf32>
    %7 = arith.divf %5, %6 : vector<32x1xf32>
    %8 = arith.mulf %1, %1 : vector<32x32xf32>
    %cst_6 = arith.constant dense<0.000000e+00> : vector<32xf32>
    %9 = vector.multi_reduction <add>, %8, %cst_6 [1] : vector<32x32xf32> to vector<32xf32>
    %10 = vector.shape_cast %9 : vector<32xf32> to vector<32x1xf32>
    %cst_7 = arith.constant 3.200000e+01 : f32
    %11 = vector.broadcast %cst_7 : f32 to vector<32x1xf32>
    %12 = arith.divf %10, %11 : vector<32x1xf32>
    %13 = arith.mulf %7, %7 : vector<32x1xf32>
    %14 = arith.subf %12, %13 : vector<32x1xf32>
    %15 = vector.broadcast %7 : vector<32x1xf32> to vector<32x32xf32>
    %16 = arith.subf %1, %15 : vector<32x32xf32>
    %cst_8 = arith.constant 9.99999974E-6 : f32
    %17 = vector.broadcast %cst_8 : f32 to vector<32x1xf32>
    %18 = arith.addf %14, %17 : vector<32x1xf32>
    %19 = math.rsqrt %18 : vector<32x1xf32>
    %20 = vector.broadcast %19 : vector<32x1xf32> to vector<32x32xf32>
    %21 = arith.mulf %16, %20 : vector<32x32xf32>
    %c0_9 = arith.constant 0 : index
    %c0_10 = arith.constant 0 : index
    %22 = vector.load %arg3[%c0_9, %c0_10] : memref<1x32xf32, #tpu.memory_space<vmem>>, vector<1x32xf32>
    %23 = vector.broadcast %22 : vector<1x32xf32> to vector<32x32xf32>
    %24 = arith.mulf %21, %23 : vector<32x32xf32>
    %c0_11 = arith.constant 0 : index
    %c0_12 = arith.constant 0 : index
    %25 = vector.load %arg4[%c0_11, %c0_12] : memref<1x32xf32, #tpu.memory_space<vmem>>, vector<1x32xf32>
    %26 = vector.broadcast %25 : vector<1x32xf32> to vector<32x32xf32>
    %27 = arith.addf %24, %26 : vector<32x32xf32>
    %28 = vector.shape_cast %27 : vector<32x32xf32> to vector<1x32x32xf32>
    %29 = vector.broadcast %28 : vector<1x32x32xf32> to vector<4x32x32xf32>
    %c0_13 = arith.constant 0 : index
    %c0_14 = arith.constant 0 : index
    %c0_15 = arith.constant 0 : index
    %30 = vector.load %arg5[%c0_13, %c0_14, %c0_15] : memref<4x32x24xf32, #tpu.memory_space<vmem>>, vector<4x32x24xf32>
    "tpu.trace_start"() <{level = 10 : i32, message = "hrd,hdf->hrf"}> : () -> ()
    %cst_16 = arith.constant dense<0.000000e+00> : vector<4x32x24xf32>
    %31 = tpu.matmul %29, %30, %cst_16 {dimension_numbers = #tpu.dot_dimension_numbers<[2], [1], [1], [2], [0, 0, 0, 1, 1, 2], [0], [0]>} : vector<4x32x32xf32>, vector<4x32x24xf32>, vector<4x32x24xf32> -> vector<4x32x24xf32>
    "tpu.trace_stop"() : () -> ()
    %32 = vector.extract_strided_slice %31 {offsets = [0, 0, 0], sizes = [4, 32, 8], strides = [1, 1, 1]} : vector<4x32x24xf32> to vector<4x32x8xf32>
    %33 = vector.extract_strided_slice %31 {offsets = [0, 0, 8], sizes = [4, 32, 8], strides = [1, 1, 1]} : vector<4x32x24xf32> to vector<4x32x8xf32>
    %34 = vector.extract_strided_slice %31 {offsets = [0, 0, 16], sizes = [4, 32, 8], strides = [1, 1, 1]} : vector<4x32x24xf32> to vector<4x32x8xf32>
    %35 = vector.shape_cast %32 : vector<4x32x8xf32> to vector<8x16x8xf32>
    %36 = vector.shape_cast %33 : vector<4x32x8xf32> to vector<8x16x8xf32>
    %37 = vector.shape_cast %34 : vector<4x32x8xf32> to vector<8x16x8xf32>
    "tpu.trace_start"() <{level = 10 : i32, message = "hqd,hkd->hqk"}> : () -> ()
    %cst_17 = arith.constant dense<0.000000e+00> : vector<8x16x16xf32>
    %38 = tpu.matmul %35, %36, %cst_17 {dimension_numbers = #tpu.dot_dimension_numbers<[2], [2], [1], [1], [0, 0, 0, 1, 1, 1], [0], [0]>} : vector<8x16x8xf32>, vector<8x16x8xf32>, vector<8x16x16xf32> -> vector<8x16x16xf32>
    "tpu.trace_stop"() : () -> ()
    %cst_18 = arith.constant dense<0xFF800000> : vector<8x16xf32>
    %39 = vector.multi_reduction <maximumf>, %38, %cst_18 [2] : vector<8x16x16xf32> to vector<8x16xf32>
    %40 = vector.shape_cast %39 : vector<8x16xf32> to vector<8x16x1xf32>
    %41 = vector.broadcast %40 : vector<8x16x1xf32> to vector<8x16x16xf32>
    %42 = arith.subf %38, %41 : vector<8x16x16xf32>
    %43 = math.exp %42 : vector<8x16x16xf32>
    %cst_19 = arith.constant dense<0.000000e+00> : vector<8x16xf32>
    %44 = vector.multi_reduction <add>, %43, %cst_19 [2] : vector<8x16x16xf32> to vector<8x16xf32>
    %45 = vector.shape_cast %44 : vector<8x16xf32> to vector<8x16x1xf32>
    %46 = tpu.reciprocal %45 {approx = true} : vector<8x16x1xf32> -> vector<8x16x1xf32>
    %47 = vector.broadcast %46 : vector<8x16x1xf32> to vector<8x16x16xf32>
    %48 = arith.mulf %43, %47 : vector<8x16x16xf32>
    "tpu.trace_start"() <{level = 10 : i32, message = "hqk,hkd->hqd"}> : () -> ()
    %cst_20 = arith.constant dense<0.000000e+00> : vector<8x16x8xf32>
    %49 = tpu.matmul %48, %37, %cst_20 {dimension_numbers = #tpu.dot_dimension_numbers<[2], [1], [1], [2], [0, 0, 0, 1, 1, 2], [0], [0]>} : vector<8x16x16xf32>, vector<8x16x8xf32>, vector<8x16x8xf32> -> vector<8x16x8xf32>
    "tpu.trace_stop"() : () -> ()
    %50 = vector.shape_cast %49 : vector<8x16x8xf32> to vector<4x32x8xf32>
    %c0_21 = arith.constant 0 : index
    %c0_22 = arith.constant 0 : index
    %c0_23 = arith.constant 0 : index
    %51 = vector.load %arg6[%c0_21, %c0_22, %c0_23] : memref<4x8x32xf32, #tpu.memory_space<vmem>>, vector<4x8x32xf32>
    "tpu.trace_start"() <{level = 10 : i32, message = "hrd,hdm->hrm"}> : () -> ()
    %cst_24 = arith.constant dense<0.000000e+00> : vector<4x32x32xf32>
    %52 = tpu.matmul %50, %51, %cst_24 {dimension_numbers = #tpu.dot_dimension_numbers<[2], [1], [1], [2], [0, 0, 0, 1, 1, 2], [0], [0]>} : vector<4x32x8xf32>, vector<4x8x32xf32>, vector<4x32x32xf32> -> vector<4x32x32xf32>
    "tpu.trace_stop"() : () -> ()
    %cst_25 = arith.constant dense<0.000000e+00> : vector<32x32xf32>
    %53 = vector.multi_reduction <add>, %52, %cst_25 [0] : vector<4x32x32xf32> to vector<32x32xf32>
    %c0_26 = arith.constant 0 : index
    %c0_27 = arith.constant 0 : index
    %54 = vector.load %arg7[%c0_26, %c0_27] : memref<1x32xf32, #tpu.memory_space<vmem>>, vector<1x32xf32>
    %55 = vector.broadcast %54 : vector<1x32xf32> to vector<32x32xf32>
    %56 = arith.addf %53, %55 : vector<32x32xf32>
    %57 = arith.addf %56, %1 : vector<32x32xf32>
    %cst_28 = arith.constant dense<0.000000e+00> : vector<32xf32>
    %58 = vector.multi_reduction <add>, %57, %cst_28 [1] : vector<32x32xf32> to vector<32xf32>
    %59 = vector.shape_cast %58 : vector<32xf32> to vector<32x1xf32>
    %cst_29 = arith.constant 3.200000e+01 : f32
    %60 = vector.broadcast %cst_29 : f32 to vector<32x1xf32>
    %61 = arith.divf %59, %60 : vector<32x1xf32>
    %62 = arith.mulf %57, %57 : vector<32x32xf32>
    %cst_30 = arith.constant dense<0.000000e+00> : vector<32xf32>
    %63 = vector.multi_reduction <add>, %62, %cst_30 [1] : vector<32x32xf32> to vector<32xf32>
    %64 = vector.shape_cast %63 : vector<32xf32> to vector<32x1xf32>
    %cst_31 = arith.constant 3.200000e+01 : f32
    %65 = vector.broadcast %cst_31 : f32 to vector<32x1xf32>
    %66 = arith.divf %64, %65 : vector<32x1xf32>
    %67 = arith.mulf %61, %61 : vector<32x1xf32>
    %68 = arith.subf %66, %67 : vector<32x1xf32>
    %69 = vector.broadcast %61 : vector<32x1xf32> to vector<32x32xf32>
    %70 = arith.subf %57, %69 : vector<32x32xf32>
    %cst_32 = arith.constant 9.99999974E-6 : f32
    %71 = vector.broadcast %cst_32 : f32 to vector<32x1xf32>
    %72 = arith.addf %68, %71 : vector<32x1xf32>
    %73 = math.rsqrt %72 : vector<32x1xf32>
    %74 = vector.broadcast %73 : vector<32x1xf32> to vector<32x32xf32>
    %75 = arith.mulf %70, %74 : vector<32x32xf32>
    %c0_33 = arith.constant 0 : index
    %c0_34 = arith.constant 0 : index
    %76 = vector.load %arg8[%c0_33, %c0_34] : memref<1x32xf32, #tpu.memory_space<vmem>>, vector<1x32xf32>
    %77 = vector.broadcast %76 : vector<1x32xf32> to vector<32x32xf32>
    %78 = arith.mulf %75, %77 : vector<32x32xf32>
    %c0_35 = arith.constant 0 : index
    %c0_36 = arith.constant 0 : index
    %79 = vector.load %arg9[%c0_35, %c0_36] : memref<1x32xf32, #tpu.memory_space<vmem>>, vector<1x32xf32>
    %80 = vector.broadcast %79 : vector<1x32xf32> to vector<32x32xf32>
    %81 = arith.addf %78, %80 : vector<32x32xf32>
    %82 = vector.shape_cast %81 : vector<32x32xf32> to vector<1x32x32xf32>
    %83 = vector.broadcast %82 : vector<1x32x32xf32> to vector<4x32x32xf32>
    %c0_37 = arith.constant 0 : index
    %c0_38 = arith.constant 0 : index
    %c0_39 = arith.constant 0 : index
    %84 = vector.load %arg10[%c0_37, %c0_38, %c0_39] : memref<4x32x8xf32, #tpu.memory_space<vmem>>, vector<4x32x8xf32>
    "tpu.trace_start"() <{level = 10 : i32, message = "hrd,hdf->hrf"}> : () -> ()
    %cst_40 = arith.constant dense<0.000000e+00> : vector<4x32x8xf32>
    %85 = tpu.matmul %83, %84, %cst_40 {dimension_numbers = #tpu.dot_dimension_numbers<[2], [1], [1], [2], [0, 0, 0, 1, 1, 2], [0], [0]>} : vector<4x32x32xf32>, vector<4x32x8xf32>, vector<4x32x8xf32> -> vector<4x32x8xf32>
    "tpu.trace_stop"() : () -> ()
    %86 = vector.shape_cast %3 : vector<16x24xf32> to vector<1x16x24xf32>
    %87 = vector.broadcast %86 : vector<1x16x24xf32> to vector<4x16x24xf32>
    %c0_41 = arith.constant 0 : index
    %c0_42 = arith.constant 0 : index
    %c0_43 = arith.constant 0 : index
    %88 = vector.load %arg11[%c0_41, %c0_42, %c0_43] : memref<4x24x16xf32, #tpu.memory_space<vmem>>, vector<4x24x16xf32>
    "tpu.trace_start"() <{level = 10 : i32, message = "hrd,hdf->hrf"}> : () -> ()
    %cst_44 = arith.constant dense<0.000000e+00> : vector<4x16x16xf32>
    %89 = tpu.matmul %87, %88, %cst_44 {dimension_numbers = #tpu.dot_dimension_numbers<[2], [1], [1], [2], [0, 0, 0, 1, 1, 2], [0], [0]>} : vector<4x16x24xf32>, vector<4x24x16xf32>, vector<4x16x16xf32> -> vector<4x16x16xf32>
    "tpu.trace_stop"() : () -> ()
    %90 = vector.extract_strided_slice %89 {offsets = [0, 0, 0], sizes = [4, 16, 8], strides = [1, 1, 1]} : vector<4x16x16xf32> to vector<4x16x8xf32>
    %91 = vector.extract_strided_slice %89 {offsets = [0, 0, 8], sizes = [4, 16, 8], strides = [1, 1, 1]} : vector<4x16x16xf32> to vector<4x16x8xf32>
    %92 = vector.shape_cast %85 : vector<4x32x8xf32> to vector<8x16x8xf32>
    %93 = vector.shape_cast %90 : vector<4x16x8xf32> to vector<8x8x8xf32>
    %94 = vector.shape_cast %91 : vector<4x16x8xf32> to vector<8x8x8xf32>
    "tpu.trace_start"() <{level = 10 : i32, message = "hqd,hkd->hqk"}> : () -> ()
    %cst_45 = arith.constant dense<0.000000e+00> : vector<8x16x8xf32>
    %95 = tpu.matmul %92, %93, %cst_45 {dimension_numbers = #tpu.dot_dimension_numbers<[2], [2], [1], [1], [0, 0, 0, 1, 1, 1], [0], [0]>} : vector<8x16x8xf32>, vector<8x8x8xf32>, vector<8x16x8xf32> -> vector<8x16x8xf32>
    "tpu.trace_stop"() : () -> ()
    %cst_46 = arith.constant dense<0xFF800000> : vector<8x16xf32>
    %96 = vector.multi_reduction <maximumf>, %95, %cst_46 [2] : vector<8x16x8xf32> to vector<8x16xf32>
    %97 = vector.shape_cast %96 : vector<8x16xf32> to vector<8x16x1xf32>
    %98 = vector.broadcast %97 : vector<8x16x1xf32> to vector<8x16x8xf32>
    %99 = arith.subf %95, %98 : vector<8x16x8xf32>
    %100 = math.exp %99 : vector<8x16x8xf32>
    %cst_47 = arith.constant dense<0.000000e+00> : vector<8x16xf32>
    %101 = vector.multi_reduction <add>, %100, %cst_47 [2] : vector<8x16x8xf32> to vector<8x16xf32>
    %102 = vector.shape_cast %101 : vector<8x16xf32> to vector<8x16x1xf32>
    %103 = tpu.reciprocal %102 {approx = true} : vector<8x16x1xf32> -> vector<8x16x1xf32>
    %104 = vector.broadcast %103 : vector<8x16x1xf32> to vector<8x16x8xf32>
    %105 = arith.mulf %100, %104 : vector<8x16x8xf32>
    "tpu.trace_start"() <{level = 10 : i32, message = "hqk,hkd->hqd"}> : () -> ()
    %cst_48 = arith.constant dense<0.000000e+00> : vector<8x16x8xf32>
    %106 = tpu.matmul %105, %94, %cst_48 {dimension_numbers = #tpu.dot_dimension_numbers<[2], [1], [1], [2], [0, 0, 0, 1, 1, 2], [0], [0]>} : vector<8x16x8xf32>, vector<8x8x8xf32>, vector<8x16x8xf32> -> vector<8x16x8xf32>
    "tpu.trace_stop"() : () -> ()
    %107 = vector.shape_cast %106 : vector<8x16x8xf32> to vector<4x32x8xf32>
    %c0_49 = arith.constant 0 : index
    %c0_50 = arith.constant 0 : index
    %c0_51 = arith.constant 0 : index
    %108 = vector.load %arg12[%c0_49, %c0_50, %c0_51] : memref<4x8x32xf32, #tpu.memory_space<vmem>>, vector<4x8x32xf32>
    "tpu.trace_start"() <{level = 10 : i32, message = "hrd,hdm->hrm"}> : () -> ()
    %cst_52 = arith.constant dense<0.000000e+00> : vector<4x32x32xf32>
    %109 = tpu.matmul %107, %108, %cst_52 {dimension_numbers = #tpu.dot_dimension_numbers<[2], [1], [1], [2], [0, 0, 0, 1, 1, 2], [0], [0]>} : vector<4x32x8xf32>, vector<4x8x32xf32>, vector<4x32x32xf32> -> vector<4x32x32xf32>
    "tpu.trace_stop"() : () -> ()
    %cst_53 = arith.constant dense<0.000000e+00> : vector<32x32xf32>
    %110 = vector.multi_reduction <add>, %109, %cst_53 [0] : vector<4x32x32xf32> to vector<32x32xf32>
    %c0_54 = arith.constant 0 : index
    %c0_55 = arith.constant 0 : index
    %111 = vector.load %arg13[%c0_54, %c0_55] : memref<1x32xf32, #tpu.memory_space<vmem>>, vector<1x32xf32>
    %112 = vector.broadcast %111 : vector<1x32xf32> to vector<32x32xf32>
    %113 = arith.addf %110, %112 : vector<32x32xf32>
    %114 = arith.addf %113, %57 : vector<32x32xf32>
    %cst_56 = arith.constant dense<0.000000e+00> : vector<32xf32>
    %115 = vector.multi_reduction <add>, %114, %cst_56 [1] : vector<32x32xf32> to vector<32xf32>
    %116 = vector.shape_cast %115 : vector<32xf32> to vector<32x1xf32>
    %cst_57 = arith.constant 3.200000e+01 : f32
    %117 = vector.broadcast %cst_57 : f32 to vector<32x1xf32>
    %118 = arith.divf %116, %117 : vector<32x1xf32>
    %119 = arith.mulf %114, %114 : vector<32x32xf32>
    %cst_58 = arith.constant dense<0.000000e+00> : vector<32xf32>
    %120 = vector.multi_reduction <add>, %119, %cst_58 [1] : vector<32x32xf32> to vector<32xf32>
    %121 = vector.shape_cast %120 : vector<32xf32> to vector<32x1xf32>
    %cst_59 = arith.constant 3.200000e+01 : f32
    %122 = vector.broadcast %cst_59 : f32 to vector<32x1xf32>
    %123 = arith.divf %121, %122 : vector<32x1xf32>
    %124 = arith.mulf %118, %118 : vector<32x1xf32>
    %125 = arith.subf %123, %124 : vector<32x1xf32>
    %126 = vector.broadcast %118 : vector<32x1xf32> to vector<32x32xf32>
    %127 = arith.subf %114, %126 : vector<32x32xf32>
    %cst_60 = arith.constant 9.99999974E-6 : f32
    %128 = vector.broadcast %cst_60 : f32 to vector<32x1xf32>
    %129 = arith.addf %125, %128 : vector<32x1xf32>
    %130 = math.rsqrt %129 : vector<32x1xf32>
    %131 = vector.broadcast %130 : vector<32x1xf32> to vector<32x32xf32>
    %132 = arith.mulf %127, %131 : vector<32x32xf32>
    %c0_61 = arith.constant 0 : index
    %c0_62 = arith.constant 0 : index
    %133 = vector.load %arg14[%c0_61, %c0_62] : memref<1x32xf32, #tpu.memory_space<vmem>>, vector<1x32xf32>
    %134 = vector.broadcast %133 : vector<1x32xf32> to vector<32x32xf32>
    %135 = arith.mulf %132, %134 : vector<32x32xf32>
    %c0_63 = arith.constant 0 : index
    %c0_64 = arith.constant 0 : index
    %136 = vector.load %arg15[%c0_63, %c0_64] : memref<1x32xf32, #tpu.memory_space<vmem>>, vector<1x32xf32>
    %137 = vector.broadcast %136 : vector<1x32xf32> to vector<32x32xf32>
    %138 = arith.addf %135, %137 : vector<32x32xf32>
    %c0_65 = arith.constant 0 : index
    %c0_66 = arith.constant 0 : index
    %139 = vector.load %arg16[%c0_65, %c0_66] : memref<32x256xf32, #tpu.memory_space<vmem>>, vector<32x256xf32>
    %cst_67 = arith.constant dense<0.000000e+00> : vector<32x256xf32>
    %140 = tpu.matmul %138, %139, %cst_67 {dimension_numbers = #tpu.dot_dimension_numbers<[1], [0], [0], [1], [0, 0, 1, 1], [], []>} : vector<32x32xf32>, vector<32x256xf32>, vector<32x256xf32> -> vector<32x256xf32>
    %c0_68 = arith.constant 0 : index
    %c0_69 = arith.constant 0 : index
    %141 = vector.load %arg17[%c0_68, %c0_69] : memref<1x256xf32, #tpu.memory_space<vmem>>, vector<1x256xf32>
    %142 = vector.broadcast %141 : vector<1x256xf32> to vector<32x256xf32>
    %143 = arith.addf %140, %142 : vector<32x256xf32>
    %144 = vector.extract_strided_slice %143 {offsets = [0, 0], sizes = [32, 128], strides = [1, 1]} : vector<32x256xf32> to vector<32x128xf32>
    %145 = vector.extract_strided_slice %143 {offsets = [0, 128], sizes = [32, 128], strides = [1, 1]} : vector<32x256xf32> to vector<32x128xf32>
    %cst_70 = arith.constant 5.000000e-01 : f32
    %146 = vector.broadcast %cst_70 : f32 to vector<32x128xf32>
    %147 = arith.mulf %146, %145 : vector<32x128xf32>
    %cst_71 = arith.constant 1.41421354 : f32
    %148 = vector.broadcast %cst_71 : f32 to vector<32x128xf32>
    %149 = arith.divf %145, %148 : vector<32x128xf32>
    %150 = math.erf %149 : vector<32x128xf32>
    %cst_72 = arith.constant 1.000000e+00 : f32
    %151 = vector.broadcast %cst_72 : f32 to vector<32x128xf32>
    %152 = arith.addf %151, %150 : vector<32x128xf32>
    %153 = arith.mulf %147, %152 : vector<32x128xf32>
    %154 = arith.mulf %144, %153 : vector<32x128xf32>
    %c0_73 = arith.constant 0 : index
    %c0_74 = arith.constant 0 : index
    %155 = vector.load %arg18[%c0_73, %c0_74] : memref<128x32xf32, #tpu.memory_space<vmem>>, vector<128x32xf32>
    %cst_75 = arith.constant dense<0.000000e+00> : vector<32x32xf32>
    %156 = tpu.matmul %154, %155, %cst_75 {dimension_numbers = #tpu.dot_dimension_numbers<[1], [0], [0], [1], [0, 0, 1, 1], [], []>} : vector<32x128xf32>, vector<128x32xf32>, vector<32x32xf32> -> vector<32x32xf32>
    %c0_76 = arith.constant 0 : index
    %c0_77 = arith.constant 0 : index
    %157 = vector.load %arg19[%c0_76, %c0_77] : memref<1x32xf32, #tpu.memory_space<vmem>>, vector<1x32xf32>
    %158 = vector.broadcast %157 : vector<1x32xf32> to vector<32x32xf32>
    %159 = arith.addf %156, %158 : vector<32x32xf32>
    %160 = arith.addf %159, %114 : vector<32x32xf32>
    %161 = vector.shape_cast %160 : vector<32x32xf32> to vector<2x16x32xf32>
    %c0_78 = arith.constant 0 : index
    %c0_79 = arith.constant 0 : index
    %c0_80 = arith.constant 0 : index
    %162 = vector.load %arg20[%c0_78, %c0_79, %c0_80] : memref<2x16x32xf32, #tpu.memory_space<vmem>>, vector<2x16x32xf32>
    tpu.vector_store %arg20[%c0_78, %c0_79, %c0_80], %161 {strides = array<i32>} : memref<2x16x32xf32, #tpu.memory_space<vmem>>, vector<2x16x32xf32>,
    return
  }
  func.func @transform_0(%arg0: i32) -> (i32, i32, i32) {
    %c0_i32 = arith.constant 0 : i32
    %c0_i32_0 = arith.constant 0 : i32
    %c0_i32_1 = arith.constant 0 : i32
    return %arg0, %c0_i32, %c0_i32_0 : i32, i32, i32
  }
  func.func @transform_1(%arg0: i32) -> (i32, i32, i32) {
    %c0_i32 = arith.constant 0 : i32
    %c0_i32_0 = arith.constant 0 : i32
    %c0_i32_1 = arith.constant 0 : i32
    return %arg0, %c0_i32, %c0_i32_0 : i32, i32, i32
  }
  func.func @transform_2(%arg0: i32) -> (i32, i32) {
    %c0_i32 = arith.constant 0 : i32
    %c0_i32_0 = arith.constant 0 : i32
    %c0_i32_1 = arith.constant 0 : i32
    return %c0_i32, %c0_i32_0 : i32, i32
  }
  func.func @transform_3(%arg0: i32) -> (i32, i32) {
    %c0_i32 = arith.constant 0 : i32
    %c0_i32_0 = arith.constant 0 : i32
    %c0_i32_1 = arith.constant 0 : i32
    return %c0_i32, %c0_i32_0 : i32, i32
  }
  func.func @transform_4(%arg0: i32) -> (i32, i32, i32) {
    %c0_i32 = arith.constant 0 : i32
    %c0_i32_0 = arith.constant 0 : i32
    %c0_i32_1 = arith.constant 0 : i32
    %c0_i32_2 = arith.constant 0 : i32
    return %c0_i32, %c0_i32_0, %c0_i32_1 : i32, i32, i32
  }
  func.func @transform_5(%arg0: i32) -> (i32, i32, i32) {
    %c0_i32 = arith.constant 0 : i32
    %c0_i32_0 = arith.constant 0 : i32
    %c0_i32_1 = arith.constant 0 : i32
    %c0_i32_2 = arith.constant 0 : i32
    return %c0_i32, %c0_i32_0, %c0_i32_1 : i32, i32, i32
  }
  func.func @transform_6(%arg0: i32) -> (i32, i32) {
    %c0_i32 = arith.constant 0 : i32
    %c0_i32_0 = arith.constant 0 : i32
    %c0_i32_1 = arith.constant 0 : i32
    return %c0_i32, %c0_i32_0 : i32, i32
  }
  func.func @transform_7(%arg0: i32) -> (i32, i32) {
    %c0_i32 = arith.constant 0 : i32
    %c0_i32_0 = arith.constant 0 : i32
    %c0_i32_1 = arith.constant 0 : i32
    return %c0_i32, %c0_i32_0 : i32, i32
  }
  func.func @transform_8(%arg0: i32) -> (i32, i32) {
    %c0_i32 = arith.constant 0 : i32
    %c0_i32_0 = arith.constant 0 : i32
    %c0_i32_1 = arith.constant 0 : i32
    return %c0_i32, %c0_i32_0 : i32, i32
  }
  func.func @transform_9(%arg0: i32) -> (i32, i32, i32) {
    %c0_i32 = arith.constant 0 : i32
    %c0_i32_0 = arith.constant 0 : i32
    %c0_i32_1 = arith.constant 0 : i32
    %c0_i32_2 = arith.constant 0 : i32
    return %c0_i32, %c0_i32_0, %c0_i32_1 : i32, i32, i32
  }
  func.func @transform_10(%arg0: i32) -> (i32, i32, i32) {
    %c0_i32 = arith.constant 0 : i32
    %c0_i32_0 = arith.constant 0 : i32
    %c0_i32_1 = arith.constant 0 : i32
    %c0_i32_2 = arith.constant 0 : i32
    return %c0_i32, %c0_i32_0, %c0_i32_1 : i32, i32, i32
  }
  func.func @transform_11(%arg0: i32) -> (i32, i32, i32) {
    %c0_i32 = arith.constant 0 : i32
    %c0_i32_0 = arith.constant 0 : i32
    %c0_i32_1 = arith.constant 0 : i32
    %c0_i32_2 = arith.constant 0 : i32
    return %c0_i32, %c0_i32_0, %c0_i32_1 : i32, i32, i32
  }
  func.func @transform_12(%arg0: i32) -> (i32, i32) {
    %c0_i32 = arith.constant 0 : i32
    %c0_i32_0 = arith.constant 0 : i32
    %c0_i32_1 = arith.constant 0 : i32
    return %c0_i32, %c0_i32_0 : i32, i32
  }
  func.func @transform_13(%arg0: i32) -> (i32, i32) {
    %c0_i32 = arith.constant 0 : i32
    %c0_i32_0 = arith.constant 0 : i32
    %c0_i32_1 = arith.constant 0 : i32
    return %c0_i32, %c0_i32_0 : i32, i32
  }
  func.func @transform_14(%arg0: i32) -> (i32, i32) {
    %c0_i32 = arith.constant 0 : i32
    %c0_i32_0 = arith.constant 0 : i32
    %c0_i32_1 = arith.constant 0 : i32
    return %c0_i32, %c0_i32_0 : i32, i32
  }
  func.func @transform_15(%arg0: i32) -> (i32, i32) {
    %c0_i32 = arith.constant 0 : i32
    %c0_i32_0 = arith.constant 0 : i32
    %c0_i32_1 = arith.constant 0 : i32
    return %c0_i32, %c0_i32_0 : i32, i32
  }
  func.func @transform_16(%arg0: i32) -> (i32, i32) {
    %c0_i32 = arith.constant 0 : i32
    %c0_i32_0 = arith.constant 0 : i32
    %c0_i32_1 = arith.constant 0 : i32
    return %c0_i32, %c0_i32_0 : i32, i32
  }
  func.func @transform_17(%arg0: i32) -> (i32, i32) {
    %c0_i32 = arith.constant 0 : i32
    %c0_i32_0 = arith.constant 0 : i32
    %c0_i32_1 = arith.constant 0 : i32
    return %c0_i32, %c0_i32_0 : i32, i32
  }
  func.func @transform_18(%arg0: i32) -> (i32, i32) {
    %c0_i32 = arith.constant 0 : i32
    %c0_i32_0 = arith.constant 0 : i32
    %c0_i32_1 = arith.constant 0 : i32
    return %c0_i32, %c0_i32_0 : i32, i32
  }
  func.func @transform_19(%arg0: i32) -> (i32, i32, i32) {
    %c0_i32 = arith.constant 0 : i32
    %c0_i32_0 = arith.constant 0 : i32
    %c0_i32_1 = arith.constant 0 : i32
    return %arg0, %c0_i32, %c0_i32_0 : i32, i32, i32
  }
}

</mosaic_0001>

<bundles_post_ra>
// kernel: tpu_custom_call.1
= control target key start
LH: loop header
LB: loop body
LE: loop exit
PB: predicated region body
PF: predicated region fallthrough
CT: control target
= control target key end

     0   :  { %s7871_s0 = inlined_call_operand.vmem [shape: f32[2,16,32], index: 0, kind: input, shape index: {}]   ;;  %s7872_s1 = inlined_call_operand.vmem [shape: f32[2,8,24], index: 1, kind: input, shape index: {}]   ;;  %s7873_s2 = inlined_call_operand.vmem [shape: f32[1,32], index: 2, kind: input, shape index: {}]   ;;  %s7874_s3 = inlined_call_operand.vmem [shape: f32[1,32], index: 3, kind: input, shape index: {}]   ;;  %s7875_s4 = inlined_call_operand.vmem [shape: f32[4,32,24], index: 4, kind: input, shape index: {}]   ;;  %s7876_s5 = inlined_call_operand.vmem [shape: f32[4,8,32], index: 5, kind: input, shape index: {}]   ;;  %s7877_s6 = inlined_call_operand.vmem [shape: f32[1,32], index: 6, kind: input, shape index: {}]   ;;  %s7878_s7 = inlined_call_operand.vmem [shape: f32[1,32], index: 7, kind: input, shape index: {}]   ;;  %s7879_s8 = inlined_call_operand.vmem [shape: f32[1,32], index: 8, kind: input, shape index: {}]   ;;  %s7880_s9 = inlined_call_operand.vmem [shape: f32[4,32,8], index: 9, kind: input, shape index: {}]   ;;  %s7881_s10 = inlined_call_operand.vmem [shape: f32[4,24,16], index: 10, kind: input, shape index: {}]   ;;  %s7882_s11 = inlined_call_operand.vmem [shape: f32[4,8,32], index: 11, kind: input, shape index: {}]   ;;  %s7883_s12 = inlined_call_operand.vmem [shape: f32[1,32], index: 12, kind: input, shape index: {}]   ;;  %s7884_s13 = inlined_call_operand.vmem [shape: f32[1,32], index: 13, kind: input, shape index: {}]   ;;  %s7885_s14 = inlined_call_operand.vmem [shape: f32[1,32], index: 14, kind: input, shape index: {}]   ;;  %s7886_s15 = inlined_call_operand.vmem [shape: f32[32,256], index: 15, kind: input, shape index: {}]   ;;  %s7887_s16 = inlined_call_operand.vmem [shape: f32[1,256], index: 16, kind: input, shape index: {}]   ;;  %s7888_s17 = inlined_call_operand.vmem [shape: f32[128,32], index: 17, kind: input, shape index: {}]   ;;  %s7889_s18 = inlined_call_operand.vmem [shape: f32[1,32], index: 18, kind: input, shape index: {}]   ;;  %s7890_s19 = inlined_call_operand.hbm [shape: f32[2,16,32], index: 19, kind: output, shape index: {}]  }
   0x1   :  { %7893 = sst [smem:[#allocation5_spill]] %s7871_s0 }
   0x2   :  { %7894 = sst [smem:[#allocation6_spill]] %s7872_s1 }
   0x3   :  { %7895 = sst [smem:[#allocation7_spill]] %s7873_s2 }
   0x4   :  { %7896 = sst [smem:[#allocation8_spill]] %s7874_s3 }
   0x5   :  { %s7897_s20 = sld [smem:[#allocation5_spill]]  ;;  %vm69_vm0 = vcmask 261120  }
   0xb   :  { %v6798_v0 = vld [vmem:[%s7897_s20] sm:$0xff]  ;;  %v6803_v1 = vld [vmem:[%s7897_s20 + $0x8] sm:$0xff] }
   0xc   :  { %v70_v2 = vsel %vm69_vm0, %v6798_v0, 0.0  ;;  %v87_v3 = vmul.f32 %v6798_v0, %v6798_v0  ;;  %v88_v4 = vmul.f32 %v6803_v1, %v6803_v1 }
   0xd   :  { %24 = vsyncpa [#allocation3], 0  ;;  %71 = vadd.xlane.f32.xlu0 %v70_v2  ;;  %v73_v6 = vsel %vm69_vm0, %v6803_v1, 0.0  ;;  %v6817_v7 = vld [vmem:[%s7897_s20 + $0x10] sm:$0xff]  ;;  %v6823_v9 = vld [vmem:[%s7897_s20 + $0x18] sm:$0xff]  ;;  %s7898_s0 = sld [smem:[#allocation7_spill]] }
   0xe   :  { %v91_v5 = vsel %vm69_vm0, %v87_v3, 0.0  ;;  %v94_v8 = vsel %vm69_vm0, %v88_v4, 0.0  ;;  %v76_v10 = vsel %vm69_vm0, %v6817_v7, 0.0  ;;  %v89_v11 = vmul.f32 %v6817_v7, %v6817_v7  ;;  %v156_v16 = vld [vmem:[%s7875_s4 + $0x18] sm:$0xff]  ;;  %v155_v18 = vld [vmem:[%s7875_s4 + $0x10] sm:$0xff]  ;;  %v154_v20 = vld [vmem:[%s7875_s4 + $0x8] sm:$0xff] }
   0xf   :  { %92 = vadd.xlane.f32.xlu1 %v91_v5  ;;  %v79_v12 = vsel %vm69_vm0, %v6823_v9, 0.0  ;;  %v90_v13 = vmul.f32 %v6823_v9, %v6823_v9  ;;  %v168_v17 = vld [vmem:[%s7875_s4 + $0x78] sm:$0xff]  ;;  %6055 = vmatprep.subr.mxu0 %v156_v16  ;;  %v167_v19 = vld [vmem:[%s7875_s4 + $0x70] sm:$0xff]  ;;  %v166_v21 = vld [vmem:[%s7875_s4 + $0x68] sm:$0xff]  ;;  %s7899_s1 = sld [smem:[#allocation8_spill]]  ;;  %vm527_vm1 = vcmask 64512  }
  0x10   :  { %v97_v14 = vsel %vm69_vm0, %v89_v11, 0.0  ;;  %6097 = vmatprep.subr.mxu1 %v168_v17  ;;  %6056 = vmatpush3.msra.mxu0 %v156_v16  ;;  %v153_v22 = vld [vmem:[%s7875_s4] sm:$0xff]  ;;  %v160_v24 = vld [vmem:[%s7875_s4 + $0x38] sm:$0xff]  ;;  %v159_v4 = vld [vmem:[%s7875_s4 + $0x30] sm:$0xff]  ;;  %s6689_s22 = smov 120   ;;  %vm1234_vm2 = vcmask 130048  }
  0x11   :  { %74 = vadd.xlane.f32.xlu0 %v73_v6  ;;  %v100_v15 = vsel %vm69_vm0, %v90_v13, 0.0  ;;  %6098 = vmatpush3.msra.mxu1 %v168_v17  ;;  %v165_v23 = vld [vmem:[%s7875_s4 + $0x60] sm:$0xff]  ;;  %v162_v16 = vld [vmem:[%s7875_s4 + $0x48] sm:$0xff]  ;;  %s7900_s29 = sld [smem:[#allocation6_spill]]  ;;  %vm3004_vm3 = vcmask 195584  }
  0x12   :  { %6057 = vmatprep.subr.mxu0 %v155_v18  ;;  %6099 = vmatprep.subr.mxu1 %v167_v19  ;;  %v161_v17 = vld [vmem:[%s7875_s4 + $0x40] sm:$0xff] }
  0x13   :  { %95 = vadd.xlane.f32.xlu1 %v94_v8  ;;  %6058 = vmatpush3.msra.mxu0 %v155_v18  ;;  %v5626_v55 = vld [vmem:[%s7898_s0] ss:$0 sm:$0xff]  ;;  %v158_v8 = vld [vmem:[%s7875_s4 + $0x28] sm:$0xff] }
  0x14   :  { %6100 = vmatpush3.msra.mxu1 %v167_v19  ;;  %6059 = vmatprep.subr.mxu0 %v154_v20 }
  0x15   :  { %77 = vadd.xlane.f32.xlu0 %v76_v10  ;;  %6060 = vmatpush3.msra.mxu0 %v154_v20  ;;  %v5627_v57 = vld [vmem:[%s7899_s1] ss:$0 sm:$0xff] }
  0x16   :  { %6101 = vmatprep.subr.mxu1 %v166_v21  ;;  %6061 = vmatprep.subr.mxu0 %v153_v22 }
  0x17   :  { %80 = vadd.xlane.f32.xlu1 %v79_v12  ;;  %6102 = vmatpush3.msra.mxu1 %v166_v21 }
  0x18   :  { %6103 = vmatprep.subr.mxu1 %v165_v23  ;;  %6062 = vmatpush3.msra.mxu0 %v153_v22 }
  0x19   :  { %98 = vadd.xlane.f32.xlu0 %v97_v14  ;;  %6104 = vmatpush3.msra.mxu1 %v165_v23  ;;  %v164_v14 = vld [vmem:[%s7875_s4 + $0x58] sm:$0xff] }
  0x1a   :  { %6069 = vmatprep.subr.mxu0 %v160_v24 }
  0x1b   :  { %101 = vadd.xlane.f32.xlu1 %v100_v15  ;;  %v163_v15 = vld [vmem:[%s7875_s4 + $0x50] sm:$0xff] }
  0x96   :  { %v72_v25 = vpop.xlane.xlu0 %71 }
  0x97   :  { %v83_v26 = vmul.f32 0.03125, %v72_v25 }
  0x98   :  { %v93_v27 = vpop.xlane.xlu1 %92 }
  0x99   :  { %v107_v28 = vmul.f32 %v83_v26, %v83_v26  ;;  %v103_v29 = vmul.f32 0.03125, %v93_v27  ;;  %v115_v53 = vsub.f32 %v6798_v0, %v83_v26 }
  0x9a   :  { %v75_v30 = vpop.xlane.xlu0 %74 }
  0x9b   :  { %v111_v31 = vsub.f32 %v103_v29, %v107_v28  ;;  %v84_v32 = vmul.f32 0.03125, %v75_v30 }
  0x9c   :  { %v96_v33 = vpop.xlane.xlu1 %95 }
  0x9d   :  { %v119_v34 = vadd.f32 1e-05, %v111_v31  ;;  %v108_v35 = vmul.f32 %v84_v32, %v84_v32  ;;  %v104_v36 = vmul.f32 0.03125, %v96_v33  ;;  %v116_v58 = vsub.f32 %v6803_v1, %v84_v32 }
  0x9e   :  { %v78_v37 = vpop.xlane.xlu0 %77 }
  0x9f   :  { %6503 = vrsqrt.f32 %v119_v34  ;;  %v112_v38 = vsub.f32 %v104_v36, %v108_v35  ;;  %v85_v39 = vmul.f32 0.03125, %v78_v37 }
  0xa0   :  { %v81_v40 = vpop.xlane.xlu1 %80 }
  0xa1   :  { %v120_v41 = vadd.f32 1e-05, %v112_v38  ;;  %v109_v42 = vmul.f32 %v85_v39, %v85_v39  ;;  %v86_v43 = vmul.f32 0.03125, %v81_v40  ;;  %v117_v0 = vsub.f32 %v6817_v7, %v85_v39 }
  0xa2   :  { %v99_v44 = vpop.xlane.xlu0 %98 }
  0xa3   :  { %6505 = vrsqrt.f32 %v120_v41  ;;  %v105_v45 = vmul.f32 0.03125, %v99_v44  ;;  %v110_v47 = vmul.f32 %v86_v43, %v86_v43  ;;  %v118_v5 = vsub.f32 %v6823_v9, %v86_v43  ;;  %v157_v9 = vld [vmem:[%s7875_s4 + $0x20] sm:$0xff]  ;;  %s6690_s4 = smov 112  }
  0xa4   :  { %v102_v46 = vpop.xlane.xlu1 %101 }
  0xa5   :  { %v113_v48 = vsub.f32 %v105_v45, %v109_v42  ;;  %v106_v49 = vmul.f32 0.03125, %v102_v46 }
  0xa7   :  { %v121_v50 = vadd.f32 1e-05, %v113_v48  ;;  %v114_v51 = vsub.f32 %v106_v49, %v110_v47 }
  0xa9   :  { %6507 = vrsqrt.f32 %v121_v50  ;;  %v122_v52 = vadd.f32 1e-05, %v114_v51 }
  0xab   :  { %6509 = vrsqrt.f32 %v122_v52 }
  0xac   :  { %v6504_v54 = vpop.eup %6503 }
  0xad   :  { %v127_v56 = vmul.f32 %v6504_v54, %v115_v53 }
  0xaf   :  { %v138_v59 = vmul.f32 %v5626_v55, %v127_v56 }
  0xb0   :  { %v6506_v60 = vpop.eup %6505 }
  0xb1   :  { %v149_v61 = vadd.f32 %v5627_v57, %v138_v59  ;;  %v128_v62 = vmul.f32 %v6506_v60, %v116_v58 }
  0xb3   :  { %6063 = vmatprep.mubr.msk.f32.mxu0 %vm69_vm0, %v149_v61  ;;  %6105 = vmatprep.mubr.msk.f32.mxu1 %vm69_vm0, %v149_v61  ;;  %v139_v63 = vmul.f32 %v5626_v55, %v128_v62 }
  0xb5   :  { %v150_v2 = vadd.f32 %v5627_v57, %v139_v63 }
  0xb6   :  { %v6508_v3 = vpop.eup %6507 }
  0xb7   :  { %6064 = vmatmul.mubr.msk.f32.vlgmr.msra.gmra.mxu0 %vm69_vm0, %v150_v2  ;;  %6106 = vmatmul.mubr.msk.f32.vlgmr.msra.gmra.mxu1 %vm69_vm0, %v150_v2  ;;  %v129_v1 = vmul.f32 %v6508_v3, %v117_v0 }
  0xb8   :  { %v6510_v6 = vpop.eup %6509  ;;  %6070 = vmatpush3.msra.mxu0 %v160_v24 }
  0xb9   :  { %v140_v7 = vmul.f32 %v5626_v55, %v129_v1  ;;  %6071 = vmatprep.subr.mxu0 %v159_v4  ;;  %v130_v10 = vmul.f32 %v6510_v6, %v118_v5 }
  0xba   :  { %6072 = vmatpush3.msra.mxu0 %v159_v4 }
  0xbb   :  { %v151_v11 = vadd.f32 %v5627_v57, %v140_v7  ;;  %v141_v12 = vmul.f32 %v5626_v55, %v130_v10  ;;  %6073 = vmatprep.subr.mxu0 %v158_v8 }
  0xbc   :  { %6074 = vmatpush3.msra.mxu0 %v158_v8 }
  0xbd   :  { %6066 = vmatprep.mubr.msk.f32.mxu0 %vm69_vm0, %v151_v11  ;;  %6108 = vmatprep.mubr.msk.f32.mxu1 %vm69_vm0, %v151_v11  ;;  %v152_v13 = vadd.f32 %v5627_v57, %v141_v12 }
  0xbe   :  { %6075 = vmatprep.subr.mxu0 %v157_v9 }
  0xbf   :  { %6067 = vmatmul.mubr.msk.f32.gmra.mxu0 %vm69_vm0, %v152_v13  ;;  %6109 = vmatmul.mubr.msk.f32.gmra.mxu1 %vm69_vm0, %v152_v13 }
  0xc0   :  { %6077 = vmatprep.mubr.msk.f32.mxu0 %vm69_vm0, %v149_v61  ;;  %6076 = vmatpush3.msra.mxu0 %v157_v9 }
  0xc1   :  { %6083 = vmatprep.subr.mxu0 %v164_v14 }
  0xc3   :  { %6078 = vmatmul.mubr.msk.f32.vlgmr.msra.gmra.mxu0 %vm69_vm0, %v150_v2 }
  0xc4   :  { %6080 = vmatprep.mubr.msk.f32.mxu0 %vm69_vm0, %v151_v11  ;;  %6084 = vmatpush3.msra.mxu0 %v164_v14 }
  0xc5   :  { %6085 = vmatprep.subr.mxu0 %v163_v15 }
  0xc6   :  { %6086 = vmatpush3.msra.mxu0 %v163_v15 }
  0xc7   :  { %6081 = vmatmul.mubr.msk.f32.gmra.mxu0 %vm69_vm0, %v152_v13  ;;  %6087 = vmatprep.subr.mxu0 %v162_v16 }
  0xc8   :  { %6088 = vmatpush3.msra.mxu0 %v162_v16  ;;  %6091 = vmatprep.mubr.msk.f32.mxu0 %vm69_vm0, %v149_v61 }
  0xc9   :  { %6089 = vmatprep.subr.mxu0 %v161_v17 }
  0xca   :  { %6090 = vmatpush3.msra.mxu0 %v161_v17 }
  0xcb   :  { %6092 = vmatmul.mubr.msk.f32.vlgmr.msra.gmra.mxu0 %vm69_vm0, %v150_v2 }
  0xcc   :  { %6094 = vmatprep.mubr.msk.f32.mxu0 %vm69_vm0, %v151_v11 }
  0xcf   :  { %6095 = vmatmul.mubr.msk.f32.gmra.mxu0 %vm69_vm0, %v152_v13 }
 0x177   :  { %v6065_v18 = vpop.f32.mrf.mxu0  ;;  %v6934_v29 = vpop.f32.mrf.mxu1 }
 0x178   :  { %525 = vrot.lane.b32.xlu0 %v6065_v18, %s6689_s22 }
 0x179   :  { %v247_v19 = vpop.f32.mrf.mxu0  ;;  %v6942_v31 = vpop.f32.mrf.mxu1 }
 0x17a   :  { %523 = vrot.lane.b32.xlu1 %v247_v19, %s6689_s22  ;;  %6115 = vmatprep.mubr.msk.f32.mxu0 %vm527_vm1, %v247_v19 }
 0x17f   :  { %v6068_v20 = vpop.f32.mrf.mxu0  ;;  %v6944_v32 = vpop.f32.mrf.mxu1 }
 0x180   :  { %615 = vrot.lane.b32.xlu1 %v6068_v20, %s6689_s22 }
 0x181   :  { %v257_v21 = vpop.f32.mrf.mxu0  ;;  %v6950_v33 = vpop.f32.mrf.mxu1 }
 0x182   :  { %6122 = vmatprep.mubr.msk.f32.mxu1 %vm527_vm1, %v257_v21 }
 0x183   :  { %v6914_v22 = vpop.f32.mrf.mxu0 }
 0x184   :  { %613 = vrot.lane.b32.xlu1 %v257_v21, %s6689_s22  ;;  %704 = vrot.lane.b32.xlu0 %v6914_v22, %s6689_s22 }
 0x185   :  { %v332_v23 = vpop.f32.mrf.mxu0 }
 0x187   :  { %v6919_v24 = vpop.f32.mrf.mxu0 }
 0x188   :  { %702 = vrot.lane.b32.xlu1 %v332_v23, %s6689_s22  ;;  %793 = vrot.lane.b32.xlu0 %v6919_v24, %s6689_s22 }
 0x189   :  { %v342_v25 = vpop.f32.mrf.mxu0 }
 0x18b   :  { %v6924_v26 = vpop.f32.mrf.mxu0 }
 0x18c   :  { %791 = vrot.lane.b32.xlu1 %v342_v25, %s6689_s22  ;;  %882 = vrot.lane.b32.xlu0 %v6924_v26, %s6689_s22 }
 0x18d   :  { %v417_v27 = vpop.f32.mrf.mxu0 }
 0x18f   :  { %v6929_v28 = vpop.f32.mrf.mxu0 }
 0x190   :  { %880 = vrot.lane.b32.xlu1 %v417_v27, %s6689_s22  ;;  %971 = vrot.lane.b32.xlu0 %v6929_v28, %s6689_s22 }
 0x191   :  { %v6936_v30 = vpop.f32.mrf.mxu0 }
 0x194   :  { %1060 = vrot.lane.b32.xlu0 %v6934_v29, %s6689_s22  ;;  %969 = vrot.lane.b32.xlu1 %v6936_v30, %s6689_s22 }
 0x198   :  { %1149 = vrot.lane.b32.xlu0 %v6944_v32, %s6689_s22  ;;  %1058 = vrot.lane.b32.xlu1 %v6942_v31, %s6689_s22 }
 0x19c   :  { %1413 = vrot.lane.b32.xlu0 %v6065_v18, %s6690_s4  ;;  %1147 = vrot.lane.b32.xlu1 %v6950_v33, %s6689_s22 }
 0x1a0   :  { %1498 = vrot.lane.b32.xlu0 %v257_v21, %s6690_s4  ;;  %1411 = vrot.lane.b32.xlu1 %v247_v19, %s6690_s4 }
 0x1a4   :  { %1674 = vrot.lane.b32.xlu0 %v6919_v24, %s6690_s4  ;;  %1500 = vrot.lane.b32.xlu1 %v6068_v20, %s6690_s4 }
 0x1a8   :  { %1672 = vrot.lane.b32.xlu0 %v342_v25, %s6690_s4  ;;  %1587 = vrot.lane.b32.xlu1 %v6914_v22, %s6690_s4 }
 0x1ac   :  { %1585 = vrot.lane.b32.xlu1 %v332_v23, %s6690_s4 }
 0x1b0   :  { %1761 = vrot.lane.b32.xlu1 %v6924_v26, %s6690_s4 }
 0x1b4   :  { %1759 = vrot.lane.b32.xlu1 %v417_v27, %s6690_s4 }
 0x1ea   :  { %v526_v34 = vpop.permute.xlu0 %525 }
 0x1eb   :  { %6111 = vmatprep.subr.msk.mxu0 %vm527_vm1, %v526_v34 }
 0x1ec   :  { %v524_v35 = vpop.permute.xlu1 %523  ;;  %6112 = vmatpush3.xpose.msk.msra.mxu0 %vm527_vm1, %v526_v34 }
 0x1ed   :  { %6113 = vmatprep.subr.msk.mxu0 %vm527_vm1, %v524_v35 }
 0x1f0   :  { %6114 = vmatpush3.xpose.msk.msra.mxu0 %vm527_vm1, %v524_v35 }
 0x1f2   :  { %v616_v36 = vpop.permute.xlu1 %615 }
 0x1f3   :  { %6116 = vmatmul.mubr.msk.f32.vlgmr.msra.gmra.mxu0 %vm527_vm1, %v6065_v18  ;;  %6118 = vmatprep.subr.msk.mxu1 %vm527_vm1, %v616_v36 }
 0x1f4   :  { %6119 = vmatpush3.xpose.msk.msra.mxu1 %vm527_vm1, %v616_v36  ;;  %6129 = vmatprep.mubr.msk.f32.mxu0 %vm527_vm1, %v332_v23 }
 0x1f6   :  { %v614_v37 = vpop.permute.xlu1 %613  ;;  %v705_v38 = vpop.permute.xlu0 %704 }
 0x1f7   :  { %6120 = vmatprep.subr.msk.mxu1 %vm527_vm1, %v614_v37  ;;  %6125 = vmatprep.subr.msk.mxu0 %vm527_vm1, %v705_v38 }
 0x1f8   :  { %6121 = vmatpush3.xpose.msk.msra.mxu1 %vm527_vm1, %v614_v37  ;;  %6126 = vmatpush3.xpose.msk.msra.mxu0 %vm527_vm1, %v705_v38 }
 0x1fa   :  { %v703_v39 = vpop.permute.xlu1 %702  ;;  %v794_v40 = vpop.permute.xlu0 %793 }
 0x1fb   :  { %6123 = vmatmul.mubr.msk.f32.vlgmr.msra.gmra.mxu1 %vm527_vm1, %v6068_v20  ;;  %6127 = vmatprep.subr.msk.mxu0 %vm527_vm1, %v703_v39 }
 0x1fc   :  { %6132 = vmatprep.subr.msk.mxu1 %vm527_vm1, %v794_v40  ;;  %6128 = vmatpush3.xpose.msk.msra.mxu0 %vm527_vm1, %v703_v39 }
 0x1fd   :  { %6133 = vmatpush3.xpose.msk.msra.mxu1 %vm527_vm1, %v794_v40  ;;  %6136 = vmatprep.mubr.msk.f32.mxu1 %vm527_vm1, %v342_v25 }
 0x1fe   :  { %v792_v41 = vpop.permute.xlu1 %791  ;;  %v883_v42 = vpop.permute.xlu0 %882 }
 0x1ff   :  { %6130 = vmatmul.mubr.msk.f32.vlgmr.msra.gmra.mxu0 %vm527_vm1, %v6914_v22  ;;  %6134 = vmatprep.subr.msk.mxu1 %vm527_vm1, %v792_v41 }
 0x200   :  { %6139 = vmatprep.subr.msk.mxu0 %vm527_vm1, %v883_v42  ;;  %6143 = vmatprep.mubr.msk.f32.mxu0 %vm527_vm1, %v417_v27 }
 0x201   :  { %6135 = vmatpush3.xpose.msk.msra.mxu1 %vm527_vm1, %v792_v41  ;;  %6140 = vmatpush3.xpose.msk.msra.mxu0 %vm527_vm1, %v883_v42 }
 0x202   :  { %v881_v43 = vpop.permute.xlu1 %880  ;;  %v972_v44 = vpop.permute.xlu0 %971 }
 0x203   :  { %6141 = vmatprep.subr.msk.mxu0 %vm527_vm1, %v881_v43  ;;  %6146 = vmatprep.subr.msk.mxu1 %vm527_vm1, %v972_v44 }
 0x204   :  { %6137 = vmatmul.mubr.msk.f32.vlgmr.msra.gmra.mxu1 %vm527_vm1, %v6919_v24 }
 0x205   :  { %6142 = vmatpush3.xpose.msk.msra.mxu0 %vm527_vm1, %v881_v43  ;;  %6147 = vmatpush3.xpose.msk.msra.mxu1 %vm527_vm1, %v972_v44 }
 0x206   :  { %6150 = vmatprep.mubr.msk.f32.mxu1 %vm527_vm1, %v6936_v30  ;;  %v970_v45 = vpop.permute.xlu1 %969  ;;  %v1061_v46 = vpop.permute.xlu0 %1060 }
 0x207   :  { %6148 = vmatprep.subr.msk.mxu1 %vm527_vm1, %v970_v45  ;;  %6153 = vmatprep.subr.msk.mxu0 %vm527_vm1, %v1061_v46 }
 0x208   :  { %6144 = vmatmul.mubr.msk.f32.vlgmr.msra.gmra.mxu0 %vm527_vm1, %v6924_v26 }
 0x209   :  { %6149 = vmatpush3.xpose.msk.msra.mxu1 %vm527_vm1, %v970_v45  ;;  %6154 = vmatpush3.xpose.msk.msra.mxu0 %vm527_vm1, %v1061_v46 }
 0x20a   :  { %6157 = vmatprep.mubr.msk.f32.mxu0 %vm527_vm1, %v6942_v31  ;;  %v1059_v47 = vpop.permute.xlu1 %1058  ;;  %v1150_v48 = vpop.permute.xlu0 %1149 }
 0x20b   :  { %6155 = vmatprep.subr.msk.mxu0 %vm527_vm1, %v1059_v47  ;;  %6160 = vmatprep.subr.msk.mxu1 %vm527_vm1, %v1150_v48 }
 0x20c   :  { %6151 = vmatmul.mubr.msk.f32.vlgmr.msra.gmra.mxu1 %vm527_vm1, %v6929_v28 }
 0x20d   :  { %6156 = vmatpush3.xpose.msk.msra.mxu0 %vm527_vm1, %v1059_v47  ;;  %6161 = vmatpush3.xpose.msk.msra.mxu1 %vm527_vm1, %v1150_v48 }
 0x20e   :  { %6164 = vmatprep.mubr.msk.f32.mxu1 %vm527_vm1, %v6950_v33  ;;  %v1148_v49 = vpop.permute.xlu1 %1147  ;;  %v1414_v50 = vpop.permute.xlu0 %1413 }
 0x20f   :  { %6162 = vmatprep.subr.msk.mxu1 %vm527_vm1, %v1148_v49  ;;  %6167 = vmatprep.subr.mxu0 %v1414_v50 }
 0x210   :  { %6158 = vmatmul.mubr.msk.f32.vlgmr.msra.gmra.mxu0 %vm527_vm1, %v6934_v29 }
 0x211   :  { %6163 = vmatpush3.xpose.msk.msra.mxu1 %vm527_vm1, %v1148_v49  ;;  %6168 = vmatpush3.msra.mxu0 %v1414_v50 }
 0x212   :  { %v1412_v51 = vpop.permute.xlu1 %1411  ;;  %v1499_v52 = vpop.permute.xlu0 %1498 }
 0x213   :  { %6169 = vmatprep.subr.mxu0 %v1412_v51 }
 0x214   :  { %6165 = vmatmul.mubr.msk.f32.vlgmr.msra.gmra.mxu1 %vm527_vm1, %v6944_v32  ;;  %6170 = vmatpush3.msra.mxu0 %v1412_v51 }
 0x216   :  { %v1501_v53 = vpop.permute.xlu1 %1500  ;;  %v7022_v54 = vpop.permute.xlu0 %1674 }
 0x217   :  { %6174 = vmatprep.subr.mxu1 %v1501_v53 }
 0x218   :  { %6175 = vmatpush3.msra.mxu1 %v1501_v53 }
 0x219   :  { %6176 = vmatprep.subr.mxu1 %v1499_v52 }
 0x21a   :  { %v7024_v55 = vpop.permute.xlu1 %1587  ;;  %6177 = vmatpush3.msra.mxu1 %v1499_v52  ;;  %v7094_v27 = vpop.permute.xlu0 %1672 }
 0x21b   :  { %6181 = vmatprep.subr.mxu0 %v7024_v55  ;;  %6188 = vmatprep.subr.mxu1 %v7022_v54 }
 0x21e   :  { %v7088_v24 = vpop.permute.xlu1 %1585 }
 0x222   :  { %v7090_v25 = vpop.permute.xlu1 %1761 }
 0x226   :  { %v7092_v26 = vpop.permute.xlu1 %1759 }
 0x2b3   :  { %v6117_v56 = vpop.f32.mrf.mxu0 }
 0x2b4   :  { %v1238_v57 = vsel %vm1234_vm2, %v6117_v56, -inf }
 0x2b5   :  { %1239 = vmax.xlane.f32.xlu1 %v1238_v57  ;;  %v602_v58 = vpop.f32.mrf.mxu0 }
 0x2b6   :  { %v1235_v59 = vsel %vm1234_vm2, %v602_v58, -inf }
 0x2b7   :  { %1236 = vmax.xlane.f32.xlu0 %v1235_v59 }
 0x2bb   :  { %v6124_v60 = vpop.f32.mrf.mxu1 }
 0x2bc   :  { %v1244_v61 = vsel %vm1234_vm2, %v6124_v60, -inf }
 0x2bd   :  { %v7031_v62 = vpop.f32.mrf.mxu1  ;;  %1245 = vmax.xlane.f32.xlu0 %v1244_v61 }
 0x2be   :  { %v1241_v0 = vsel %vm1234_vm2, %v7031_v62, -inf }
 0x2bf   :  { %v6131_v63 = vpop.f32.mrf.mxu0 }
 0x2c0   :  { %v1250_v2 = vsel %vm1234_vm2, %v6131_v63, -inf }
 0x2c1   :  { %1242 = vmax.xlane.f32.xlu0 %v1241_v0  ;;  %1251 = vmax.xlane.f32.xlu1 %v1250_v2  ;;  %v7036_v3 = vpop.f32.mrf.mxu0 }
 0x2c2   :  { %v1247_v4 = vsel %vm1234_vm2, %v7036_v3, -inf }
 0x2c4   :  { %v7040_v5 = vpop.f32.mrf.mxu1 }
 0x2c5   :  { %1248 = vmax.xlane.f32.xlu0 %v1247_v4  ;;  %v1256_v6 = vsel %vm1234_vm2, %v7040_v5, -inf }
 0x2c6   :  { %v7046_v8 = vpop.f32.mrf.mxu1 }
 0x2c7   :  { %v1253_v11 = vsel %vm1234_vm2, %v7046_v8, -inf }
 0x2c8   :  { %v7042_v1 = vpop.f32.mrf.mxu0 }
 0x2c9   :  { %1257 = vmax.xlane.f32.xlu0 %v1256_v6  ;;  %v1262_v7 = vsel %vm1234_vm2, %v7042_v1, -inf }
 0x2ca   :  { %1263 = vmax.xlane.f32.xlu1 %v1262_v7  ;;  %v7050_v10 = vpop.f32.mrf.mxu0 }
 0x2cb   :  { %v1259_v9 = vsel %vm1234_vm2, %v7050_v10, -inf }
 0x2cc   :  { %v7054_v12 = vpop.f32.mrf.mxu1 }
 0x2cd   :  { %1254 = vmax.xlane.f32.xlu0 %v1253_v11  ;;  %v1268_v14 = vsel %vm1234_vm2, %v7054_v12, -inf }
 0x2ce   :  { %1260 = vmax.xlane.f32.xlu1 %v1259_v9  ;;  %v7062_v15 = vpop.f32.mrf.mxu1 }
 0x2cf   :  { %v1265_v19 = vsel %vm1234_vm2, %v7062_v15, -inf }
 0x2d0   :  { %v7058_v13 = vpop.f32.mrf.mxu0 }
 0x2d1   :  { %1269 = vmax.xlane.f32.xlu0 %v1268_v14  ;;  %v1274_v16 = vsel %vm1234_vm2, %v7058_v13, -inf }
 0x2d2   :  { %1275 = vmax.xlane.f32.xlu1 %v1274_v16  ;;  %v7066_v17 = vpop.f32.mrf.mxu0 }
 0x2d3   :  { %v1271_v20 = vsel %vm1234_vm2, %v7066_v17, -inf }
 0x2d4   :  { %v7068_v18 = vpop.f32.mrf.mxu1 }
 0x2d5   :  { %1266 = vmax.xlane.f32.xlu0 %v1265_v19  ;;  %v1280_v23 = vsel %vm1234_vm2, %v7068_v18, -inf }
 0x2d6   :  { %1272 = vmax.xlane.f32.xlu1 %v1271_v20  ;;  %v7074_v21 = vpop.f32.mrf.mxu1 }
 0x2d7   :  { %v1277_v22 = vsel %vm1234_vm2, %v7074_v21, -inf }
 0x2d9   :  { %1278 = vmax.xlane.f32.xlu0 %v1277_v22 }
 0x2da   :  { %1281 = vmax.xlane.f32.xlu1 %v1280_v23 }
 0x2eb   :  { %1935 = vrot.lane.b32.xlu1 %v6934_v29, %s6690_s4 }
 0x2ef   :  { %1933 = vrot.lane.b32.xlu1 %v6942_v31, %s6690_s4  ;;  %1848 = vrot.lane.b32.xlu0 %v6929_v28, %s6690_s4 }
 0x2f3   :  { %1846 = vrot.lane.b32.xlu0 %v6936_v30, %s6690_s4 }
 0x33e   :  { %v1240_v34 = vpop.xlane.xlu1 %1239 }
 0x33f   :  { %v1284_v35 = vsub.f32 %v6117_v56, %v1240_v34 }
 0x340   :  { %v1237_v29 = vpop.xlane.xlu0 %1236 }
 0x341   :  { %v1301_v36 = vmul.f32 1.442695, %v1284_v35  ;;  %v1283_v37 = vsub.f32 %v602_v58, %v1237_v29 }
 0x343   :  { %6511 = vpow2.f32 %v1301_v36  ;;  %v1299_v31 = vmul.f32 1.442695, %v1283_v37 }
 0x345   :  { %6513 = vpow2.f32 %v1299_v31 }
 0x346   :  { %v1246_v28 = vpop.xlane.xlu0 %1245 }
 0x347   :  { %v1286_v38 = vsub.f32 %v6124_v60, %v1246_v28 }
 0x349   :  { %v1305_v39 = vmul.f32 1.442695, %v1286_v38 }
 0x34a   :  { %v1252_v30 = vpop.xlane.xlu1 %1251  ;;  %v1243_v40 = vpop.xlane.xlu0 %1242 }
 0x34b   :  { %6515 = vpow2.f32 %v1305_v39  ;;  %v1288_v41 = vsub.f32 %v6131_v63, %v1252_v30  ;;  %v1285_v42 = vsub.f32 %v7031_v62, %v1243_v40 }
 0x34d   :  { %v1309_v43 = vmul.f32 1.442695, %v1288_v41  ;;  %v1303_v44 = vmul.f32 1.442695, %v1285_v42 }
 0x34e   :  { %v1249_v45 = vpop.xlane.xlu0 %1248 }
 0x34f   :  { %6517 = vpow2.f32 %v1309_v43  ;;  %v1287_v46 = vsub.f32 %v7036_v3, %v1249_v45 }
 0x350   :  { %v7098_v47 = vpop.eup %6511  ;;  %6519 = vpow2.f32 %v1303_v44 }
 0x351   :  { %v1307_v48 = vmul.f32 1.442695, %v1287_v46  ;;  %v1334_v49 = vsel %vm1234_vm2, %v7098_v47, 0.0 }
 0x352   :  { %v7102_v50 = vpop.eup %6513  ;;  %1335 = vadd.xlane.f32.xlu1 %v1334_v49  ;;  %v1258_v51 = vpop.xlane.xlu0 %1257 }
 0x353   :  { %6521 = vpow2.f32 %v1307_v48  ;;  %v1264_v52 = vpop.xlane.xlu1 %1263  ;;  %v1290_v53 = vsub.f32 %v7040_v5, %v1258_v51  ;;  %v1331_v56 = vsel %vm1234_vm2, %v7102_v50, 0.0 }
 0x354   :  { %v1292_v57 = vsub.f32 %v7042_v1, %v1264_v52  ;;  %1332 = vadd.xlane.f32.xlu0 %v1331_v56 }
 0x355   :  { %v1313_v58 = vmul.f32 1.442695, %v1290_v53 }
 0x356   :  { %v1317_v59 = vmul.f32 1.442695, %v1292_v57  ;;  %v1255_v60 = vpop.xlane.xlu0 %1254 }
 0x357   :  { %6523 = vpow2.f32 %v1313_v58  ;;  %v1261_v61 = vpop.xlane.xlu1 %1260  ;;  %v1289_v62 = vsub.f32 %v7046_v8, %v1255_v60 }
 0x358   :  { %v7109_v63 = vpop.eup %6515  ;;  %6525 = vpow2.f32 %v1317_v59  ;;  %v1291_v0 = vsub.f32 %v7050_v10, %v1261_v61 }
 0x359   :  { %v1311_v2 = vmul.f32 1.442695, %v1289_v62  ;;  %v1340_v3 = vsel %vm1234_vm2, %v7109_v63, 0.0 }
 0x35a   :  { %v1315_v4 = vmul.f32 1.442695, %v1291_v0  ;;  %1341 = vadd.xlane.f32.xlu0 %v1340_v3  ;;  %v1270_v5 = vpop.xlane.xlu0 %1269 }
 0x35b   :  { %6527 = vpow2.f32 %v1311_v2  ;;  %v1276_v1 = vpop.xlane.xlu1 %1275  ;;  %v1294_v6 = vsub.f32 %v7054_v12, %v1270_v5 }
 0x35c   :  { %v7115_v7 = vpop.eup %6517  ;;  %6529 = vpow2.f32 %v1315_v4  ;;  %v1296_v8 = vsub.f32 %v7058_v13, %v1276_v1 }
 0x35d   :  { %v7118_v11 = vpop.eup %6519  ;;  %v1321_v9 = vmul.f32 1.442695, %v1294_v6  ;;  %v1346_v10 = vsel %vm1234_vm2, %v7115_v7, 0.0 }
 0x35e   :  { %v1325_v14 = vmul.f32 1.442695, %v1296_v8  ;;  %1347 = vadd.xlane.f32.xlu1 %v1346_v10  ;;  %v1337_v16 = vsel %vm1234_vm2, %v7118_v11, 0.0  ;;  %v1267_v19 = vpop.xlane.xlu0 %1266 }
 0x35f   :  { %6531 = vpow2.f32 %v1321_v9  ;;  %v1273_v20 = vpop.xlane.xlu1 %1272  ;;  %1338 = vadd.xlane.f32.xlu0 %v1337_v16  ;;  %v1293_v12 = vsub.f32 %v7062_v15, %v1267_v19 }
 0x360   :  { %v7125_v22 = vpop.eup %6521  ;;  %6533 = vpow2.f32 %v1325_v14  ;;  %v1295_v13 = vsub.f32 %v7066_v17, %v1273_v20 }
 0x361   :  { %v1319_v23 = vmul.f32 1.442695, %v1293_v12  ;;  %v1343_v34 = vsel %vm1234_vm2, %v7125_v22, 0.0 }
 0x362   :  { %v1323_v35 = vmul.f32 1.442695, %v1295_v13  ;;  %1344 = vadd.xlane.f32.xlu1 %v1343_v34  ;;  %v1279_v29 = vpop.xlane.xlu0 %1278 }
 0x363   :  { %6535 = vpow2.f32 %v1319_v23  ;;  %v1282_v36 = vpop.xlane.xlu1 %1281  ;;  %v1297_v37 = vsub.f32 %v7074_v21, %v1279_v29 }
 0x364   :  { %v7131_v31 = vpop.eup %6523  ;;  %6537 = vpow2.f32 %v1323_v35  ;;  %v1298_v15 = vsub.f32 %v7068_v18, %v1282_v36 }
 0x365   :  { %v7134_v28 = vpop.eup %6525  ;;  %v1327_v38 = vmul.f32 1.442695, %v1297_v37  ;;  %v1352_v17 = vsel %vm1234_vm2, %v7131_v31, 0.0 }
 0x366   :  { %v1329_v39 = vmul.f32 1.442695, %v1298_v15  ;;  %v1358_v30 = vsel %vm1234_vm2, %v7134_v28, 0.0  ;;  %1353 = vadd.xlane.f32.xlu0 %v1352_v17  ;;  %v7178_v59 = vpop.permute.xlu0 %1848 }
 0x367   :  { %6539 = vpow2.f32 %v1327_v38  ;;  %1359 = vadd.xlane.f32.xlu1 %v1358_v30  ;;  %v7176_v58 = vpop.permute.xlu1 %1935 }
 0x368   :  { %v7140_v40 = vpop.eup %6527  ;;  %6541 = vpow2.f32 %v1329_v39 }
 0x369   :  { %v7142_v21 = vpop.eup %6529  ;;  %v1349_v18 = vsel %vm1234_vm2, %v7140_v40, 0.0 }
 0x36a   :  { %v1355_v41 = vsel %vm1234_vm2, %v7142_v21, 0.0  ;;  %1350 = vadd.xlane.f32.xlu0 %v1349_v18  ;;  %v7182_v61 = vpop.permute.xlu0 %1846 }
 0x36b   :  { %1356 = vadd.xlane.f32.xlu1 %v1355_v41  ;;  %v7180_v60 = vpop.permute.xlu1 %1933 }
 0x36c   :  { %v7148_v42 = vpop.eup %6531 }
 0x36d   :  { %v7150_v43 = vpop.eup %6533  ;;  %v1364_v44 = vsel %vm1234_vm2, %v7148_v42, 0.0 }
 0x36e   :  { %v1370_v45 = vsel %vm1234_vm2, %v7150_v43, 0.0  ;;  %1365 = vadd.xlane.f32.xlu0 %v1364_v44 }
 0x36f   :  { %1371 = vadd.xlane.f32.xlu1 %v1370_v45 }
 0x370   :  { %v7156_v46 = vpop.eup %6535 }
 0x371   :  { %v7158_v48 = vpop.eup %6537  ;;  %v1361_v49 = vsel %vm1234_vm2, %v7156_v46, 0.0 }
 0x372   :  { %v1367_v51 = vsel %vm1234_vm2, %v7158_v48, 0.0  ;;  %1362 = vadd.xlane.f32.xlu0 %v1361_v49 }
 0x373   :  { %1368 = vadd.xlane.f32.xlu1 %v1367_v51 }
 0x374   :  { %v7164_v52 = vpop.eup %6539 }
 0x375   :  { %v7166_v53 = vpop.eup %6541  ;;  %v1373_v56 = vsel %vm1234_vm2, %v7164_v52, 0.0 }
 0x376   :  { %v1376_v57 = vsel %vm1234_vm2, %v7166_v53, 0.0  ;;  %1374 = vadd.xlane.f32.xlu0 %v1373_v56 }
 0x377   :  { %1377 = vadd.xlane.f32.xlu1 %v1376_v57 }
 0x388   :  { %2020 = vrot.lane.b32.xlu1 %v6950_v33, %s6690_s4 }
 0x38c   :  { %2022 = vrot.lane.b32.xlu0 %v6944_v32, %s6690_s4 }
 0x3db   :  { %v1336_v62 = vpop.xlane.xlu1 %1335 }
 0x3dc   :  { %6543 = vrcp.f32 %v1336_v62 }
 0x3dd   :  { %v1333_v0 = vpop.xlane.xlu0 %1332 }
 0x3de   :  { %6545 = vrcp.f32 %v1333_v0 }
 0x3e3   :  { %v1342_v2 = vpop.xlane.xlu0 %1341 }
 0x3e4   :  { %6547 = vrcp.f32 %v1342_v2 }
 0x3e7   :  { %v1348_v3 = vpop.xlane.xlu1 %1347 }
 0x3e8   :  { %v1339_v4 = vpop.xlane.xlu0 %1338 }
 0x3e9   :  { %6549 = vrcp.f32 %v1339_v4  ;;  %v6544_v33 = vpop.eup %6543 }
 0x3ea   :  { %6551 = vrcp.f32 %v1348_v3  ;;  %v1396_v6 = vmul.f32 %v6544_v33, %v7098_v47 }
 0x3eb   :  { %v6546_v5 = vpop.eup %6545  ;;  %v1345_v32 = vpop.xlane.xlu1 %1344 }
 0x3ec   :  { %6553 = vrcp.f32 %v1345_v32  ;;  %v1395_v1 = vmul.f32 %v6546_v5, %v7102_v50 }
 0x3ee   :  { %6171 = vmatprep.mubr.msk.f32.mxu0 %vm1234_vm2, %v1395_v1 }
 0x3ef   :  { %6172 = vmatmul.mubr.msk.f32.vlgmr.msra.gmra.mxu0 %vm1234_vm2, %v1396_v6  ;;  %v1354_v8 = vpop.xlane.xlu0 %1353 }
 0x3f0   :  { %v1360_v9 = vpop.xlane.xlu1 %1359  ;;  %6182 = vmatpush3.msra.mxu0 %v7024_v55  ;;  %6555 = vrcp.f32 %v1354_v8 }
 0x3f1   :  { %6183 = vmatprep.subr.mxu0 %v7088_v24  ;;  %6557 = vrcp.f32 %v1360_v9  ;;  %v6548_v47 = vpop.eup %6547 }
 0x3f2   :  { %6184 = vmatpush3.msra.mxu0 %v7088_v24  ;;  %v1398_v55 = vmul.f32 %v6548_v47, %v7109_v63 }
 0x3f3   :  { %6195 = vmatprep.subr.mxu0 %v7090_v25  ;;  %v1351_v10 = vpop.xlane.xlu0 %1350 }
 0x3f4   :  { %v1357_v50 = vpop.xlane.xlu1 %1356  ;;  %6559 = vrcp.f32 %v1351_v10 }
 0x3f5   :  { %6561 = vrcp.f32 %v1357_v50 }
 0x3f6   :  { %v6550_v14 = vpop.eup %6549 }
 0x3f7   :  { %v1366_v16 = vpop.xlane.xlu0 %1365  ;;  %v1397_v19 = vmul.f32 %v6550_v14, %v7118_v11  ;;  %v6552_v20 = vpop.eup %6551 }
 0x3f8   :  { %v1372_v12 = vpop.xlane.xlu1 %1371  ;;  %6563 = vrcp.f32 %v1366_v16  ;;  %v1400_v34 = vmul.f32 %v6552_v20, %v7115_v7 }
 0x3f9   :  { %v6554_v13 = vpop.eup %6553  ;;  %6178 = vmatprep.mubr.msk.f32.mxu1 %vm1234_vm2, %v1397_v19  ;;  %6565 = vrcp.f32 %v1372_v12 }
 0x3fa   :  { %6179 = vmatmul.mubr.msk.f32.vlgmr.msra.gmra.mxu1 %vm1234_vm2, %v1398_v55  ;;  %v1399_v24 = vmul.f32 %v6554_v13, %v7125_v22 }
 0x3fb   :  { %6189 = vmatpush3.msra.mxu1 %v7022_v54  ;;  %v1363_v23 = vpop.xlane.xlu0 %1362 }
 0x3fc   :  { %6190 = vmatprep.subr.mxu1 %v7094_v27  ;;  %v1369_v11 = vpop.xlane.xlu1 %1368  ;;  %6567 = vrcp.f32 %v1363_v23  ;;  %6185 = vmatprep.mubr.msk.f32.mxu0 %vm1234_vm2, %v1399_v24 }
 0x3fd   :  { %6569 = vrcp.f32 %v1369_v11  ;;  %6191 = vmatpush3.msra.mxu1 %v7094_v27  ;;  %6186 = vmatmul.mubr.msk.f32.vlgmr.msra.gmra.mxu0 %vm1234_vm2, %v1400_v34  ;;  %v6556_v63 = vpop.eup %6555 }
 0x3fe   :  { %6202 = vmatprep.subr.mxu1 %v7178_v59  ;;  %6196 = vmatpush3.msra.mxu0 %v7090_v25  ;;  %v6558_v7 = vpop.eup %6557  ;;  %v1402_v25 = vmul.f32 %v6556_v63, %v7131_v31 }
 0x3ff   :  { %6197 = vmatprep.subr.mxu0 %v7092_v26  ;;  %v1375_v54 = vpop.xlane.xlu0 %1374  ;;  %v1404_v37 = vmul.f32 %v6558_v7, %v7134_v28 }
 0x400   :  { %v1378_v22 = vpop.xlane.xlu1 %1377  ;;  %6198 = vmatpush3.msra.mxu0 %v7092_v26  ;;  %6571 = vrcp.f32 %v1375_v54 }
 0x401   :  { %v6560_v35 = vpop.eup %6559  ;;  %6573 = vrcp.f32 %v1378_v22  ;;  %6209 = vmatprep.subr.mxu0 %v7176_v58 }
 0x402   :  { %v6562_v27 = vpop.eup %6561  ;;  %v1401_v29 = vmul.f32 %v6560_v35, %v7140_v40 }
 0x403   :  { %v1403_v36 = vmul.f32 %v6562_v27, %v7142_v21  ;;  %v2023_v38 = vpop.permute.xlu0 %2022  ;;  %v5708_v27 = vld [vmem:[%s7877_s6] ss:$0 sm:$0xff] }
 0x404   :  { %6192 = vmatprep.mubr.msk.f32.mxu1 %vm1234_vm2, %v1401_v29  ;;  %v2021_v41 = vpop.permute.xlu1 %2020 }
 0x405   :  { %6199 = vmatprep.mubr.msk.f32.mxu0 %vm1234_vm2, %v1403_v36  ;;  %6193 = vmatmul.mubr.msk.f32.vlgmr.msra.gmra.mxu1 %vm1234_vm2, %v1402_v25  ;;  %v6564_v26 = vpop.eup %6563 }
 0x406   :  { %6200 = vmatmul.mubr.msk.f32.vlgmr.msra.gmra.mxu0 %vm1234_vm2, %v1404_v37  ;;  %6203 = vmatpush3.msra.mxu1 %v7178_v59  ;;  %v6566_v15 = vpop.eup %6565  ;;  %v1406_v30 = vmul.f32 %v6564_v26, %v7148_v42  ;;  %v2107_v42 = vld [vmem:[%s7876_s5] sm:$0xff] }
 0x407   :  { %6210 = vmatpush3.msra.mxu0 %v7176_v58  ;;  %6204 = vmatprep.subr.mxu1 %v7182_v61  ;;  %v1408_v40 = vmul.f32 %v6566_v15, %v7150_v43  ;;  %v2108_v43 = vld [vmem:[%s7876_s5 + $0x8] sm:$0xff] }
 0x408   :  { %6211 = vmatprep.subr.mxu0 %v7180_v60  ;;  %6205 = vmatpush3.msra.mxu1 %v7182_v61 }
 0x409   :  { %v6568_v31 = vpop.eup %6567  ;;  %6212 = vmatpush3.msra.mxu0 %v7180_v60  ;;  %6216 = vmatprep.subr.mxu1 %v2023_v38 }
 0x40a   :  { %v6570_v28 = vpop.eup %6569  ;;  %v1405_v17 = vmul.f32 %v6568_v31, %v7156_v46  ;;  %6223 = vmatprep.subr.mxu0 %v2107_v42  ;;  %v2109_v46 = vld [vmem:[%s7876_s5 + $0x10] sm:$0xff] }
 0x40b   :  { %v1407_v39 = vmul.f32 %v6570_v28, %v7158_v48  ;;  %v2110_v48 = vld [vmem:[%s7876_s5 + $0x18] sm:$0xff] }
 0x40c   :  { %6206 = vmatprep.mubr.msk.f32.mxu1 %vm1234_vm2, %v1405_v17 }
 0x40d   :  { %v6572_v21 = vpop.eup %6571  ;;  %6213 = vmatprep.mubr.msk.f32.mxu0 %vm1234_vm2, %v1407_v39  ;;  %6207 = vmatmul.mubr.msk.f32.vlgmr.msra.gmra.mxu1 %vm1234_vm2, %v1406_v30 }
 0x40e   :  { %v6574_v18 = vpop.eup %6573  ;;  %6214 = vmatmul.mubr.msk.f32.vlgmr.msra.gmra.mxu0 %vm1234_vm2, %v1408_v40  ;;  %6217 = vmatpush3.msra.mxu1 %v2023_v38  ;;  %v1409_v44 = vmul.f32 %v6572_v21, %v7164_v52 }
 0x40f   :  { %6218 = vmatprep.subr.mxu1 %v2021_v41  ;;  %v1410_v45 = vmul.f32 %v6574_v18, %v7166_v53  ;;  %6224 = vmatpush3.msra.mxu0 %v2107_v42 }
 0x410   :  { %6219 = vmatpush3.msra.mxu1 %v2021_v41  ;;  %6220 = vmatprep.mubr.msk.f32.mxu1 %vm1234_vm2, %v1409_v44  ;;  %v6663_v41 = vld [vmem:[%s7897_s20 + $0x8] sm:$0xff] }
 0x411   :  { %6221 = vmatmul.mubr.msk.f32.vlgmr.msra.gmra.mxu1 %vm1234_vm2, %v1410_v45  ;;  %6231 = vmatprep.subr.mxu1 %v2108_v43 }
 0x412   :  { %6232 = vmatpush3.msra.mxu1 %v2108_v43  ;;  %6239 = vmatprep.subr.mxu0 %v2109_v46 }
 0x413   :  { %6247 = vmatprep.subr.mxu1 %v2110_v48 }
 0x4af   :  { %v6173_v49 = vpop.f32.mrf.mxu0 }
 0x4b1   :  { %v1489_v51 = vpop.f32.mrf.mxu0 }
 0x4b2   :  { %6225 = vmatprep.mubr.msk.f32.mxu0 %vm527_vm1, %v1489_v51 }
 0x4b3   :  { %6226 = vmatmul.mubr.msk.f32.vlgmr.msra.gmra.mxu0 %vm527_vm1, %v6173_v49  ;;  %v6664_v49 = vld [vmem:[%s7897_s20] sm:$0xff] }
 0x4b4   :  { %6240 = vmatpush3.msra.mxu0 %v2109_v46 }
 0x4ba   :  { %v6180_v52 = vpop.f32.mrf.mxu1 }
 0x4bc   :  { %v1576_v53 = vpop.f32.mrf.mxu1 }
 0x4bd   :  { %6228 = vmatprep.mubr.msk.f32.mxu0 %vm527_vm1, %v1576_v53  ;;  %v6187_v56 = vpop.f32.mrf.mxu0 }
 0x4be   :  { %6229 = vmatmul.mubr.msk.f32.gmra.mxu0 %vm527_vm1, %v6180_v52 }
 0x4bf   :  { %v1663_v57 = vpop.f32.mrf.mxu0 }
 0x4c0   :  { %6233 = vmatprep.mubr.msk.f32.mxu1 %vm527_vm1, %v1663_v57 }
 0x4c1   :  { %6234 = vmatmul.mubr.msk.f32.vlgmr.msra.gmra.mxu1 %vm527_vm1, %v6187_v56  ;;  %v6665_v56 = vld [vmem:[%s7897_s20 + $0x18] sm:$0xff] }
 0x4c2   :  { %6248 = vmatpush3.msra.mxu1 %v2110_v48 }
 0x4c5   :  { %v6194_v58 = vpop.f32.mrf.mxu1 }
 0x4c6   :  { %v6201_v59 = vpop.f32.mrf.mxu0 }
 0x4c7   :  { %v1750_v60 = vpop.f32.mrf.mxu1 }
 0x4c8   :  { %v1837_v61 = vpop.f32.mrf.mxu0  ;;  %6236 = vmatprep.mubr.msk.f32.mxu1 %vm527_vm1, %v1750_v60 }
 0x4c9   :  { %6241 = vmatprep.mubr.msk.f32.mxu0 %vm527_vm1, %v1837_v61  ;;  %6237 = vmatmul.mubr.msk.f32.gmra.mxu1 %vm527_vm1, %v6194_v58 }
 0x4ca   :  { %6242 = vmatmul.mubr.msk.f32.vlgmr.msra.gmra.mxu0 %vm527_vm1, %v6201_v59 }
 0x4cd   :  { %v6208_v62 = vpop.f32.mrf.mxu1 }
 0x4ce   :  { %v6215_v0 = vpop.f32.mrf.mxu0 }
 0x4cf   :  { %v1924_v2 = vpop.f32.mrf.mxu1 }
 0x4d0   :  { %v2011_v3 = vpop.f32.mrf.mxu0  ;;  %6244 = vmatprep.mubr.msk.f32.mxu0 %vm527_vm1, %v1924_v2 }
 0x4d1   :  { %6249 = vmatprep.mubr.msk.f32.mxu1 %vm527_vm1, %v2011_v3  ;;  %v6222_v4 = vpop.f32.mrf.mxu1  ;;  %6245 = vmatmul.mubr.msk.f32.gmra.mxu0 %vm527_vm1, %v6208_v62 }
 0x4d2   :  { %6250 = vmatmul.mubr.msk.f32.vlgmr.msra.gmra.mxu1 %vm527_vm1, %v6215_v0 }
 0x4d3   :  { %v2098_v33 = vpop.f32.mrf.mxu1 }
 0x4d4   :  { %6252 = vmatprep.mubr.msk.f32.mxu1 %vm527_vm1, %v2098_v33  ;;  %v6666_v33 = vld [vmem:[%s7897_s20 + $0x10] sm:$0xff] }
 0x4d6   :  { %6253 = vmatmul.mubr.msk.f32.gmra.mxu1 %vm527_vm1, %v6222_v4 }
 0x573   :  { %v6227_v5 = vpop.f32.mrf.mxu0 }
 0x574   :  { %v2506_v16 = vsel %vm69_vm0, %v6227_v5, 0.0 }
 0x575   :  { %v2189_v32 = vpop.f32.mrf.mxu0 }
 0x576   :  { %v2499_v13 = vsel %vm69_vm0, %v2189_v32, 0.0 }
 0x57e   :  { %v6230_v1 = vpop.f32.mrf.mxu0 }
 0x57f   :  { %v2520_v7 = vsel %vm69_vm0, %v6230_v1, 0.0 }
 0x580   :  { %v2199_v8 = vpop.f32.mrf.mxu0 }
 0x581   :  { %v6235_v6 = vpop.f32.mrf.mxu1  ;;  %v2513_v30 = vsel %vm69_vm0, %v2199_v8, 0.0 }
 0x582   :  { %v2507_v47 = vsel %vm69_vm0, %v6235_v6, 0.0 }
 0x583   :  { %v2286_v9 = vpop.f32.mrf.mxu1  ;;  %v2508_v12 = vadd.f32 %v2507_v47, %v2506_v16  ;;  %v2630_v47 = vld [vmem:[%s7880_s9 + $0x30] sm:$0xff]  ;;  %v2629_v16 = vld [vmem:[%s7880_s9 + $0x28] sm:$0xff] }
 0x584   :  { %v2500_v19 = vsel %vm69_vm0, %v2286_v9, 0.0  ;;  %v2627_v9 = vld [vmem:[%s7880_s9 + $0x18] sm:$0xff] }
 0x585   :  { %v2501_v11 = vadd.f32 %v2500_v19, %v2499_v13  ;;  %6255 = vmatprep.subr.mxu0 %v2627_v9  ;;  %v2624_v19 = vld [vmem:[%s7880_s9] sm:$0xff] }
 0x586   :  { %6256 = vmatpush3.msra.mxu0 %v2627_v9 }
 0x589   :  { %v6238_v50 = vpop.f32.mrf.mxu1 }
 0x58a   :  { %v6243_v10 = vpop.f32.mrf.mxu0  ;;  %v2521_v24 = vsel %vm69_vm0, %v6238_v50, 0.0  ;;  %v2626_v50 = vld [vmem:[%s7880_s9 + $0x10] sm:$0xff] }
 0x58b   :  { %v2509_v20 = vsel %vm69_vm0, %v6243_v10, 0.0  ;;  %v2296_v55 = vpop.f32.mrf.mxu1  ;;  %v2522_v29 = vadd.f32 %v2521_v24, %v2520_v7  ;;  %v2631_v10 = vld [vmem:[%s7880_s9 + $0x38] sm:$0xff]  ;;  %6257 = vmatprep.subr.mxu0 %v2626_v50 }
 0x58c   :  { %v2383_v14 = vpop.f32.mrf.mxu0  ;;  %v2510_v63 = vadd.f32 %v2509_v20, %v2508_v12  ;;  %v2514_v15 = vsel %vm69_vm0, %v2296_v55, 0.0  ;;  %6269 = vmatprep.subr.mxu1 %v2631_v10  ;;  %6258 = vmatpush3.msra.mxu0 %v2626_v50  ;;  %v2628_v20 = vld [vmem:[%s7880_s9 + $0x20] sm:$0xff]  ;;  %v2635_v12 = vld [vmem:[%s7880_s9 + $0x58] sm:$0xff] }
 0x58d   :  { %v2502_v23 = vsel %vm69_vm0, %v2383_v14, 0.0  ;;  %v2515_v18 = vadd.f32 %v2514_v15, %v2513_v30  ;;  %6270 = vmatpush3.msra.mxu1 %v2631_v10  ;;  %v2625_v14 = vld [vmem:[%s7880_s9 + $0x8] sm:$0xff]  ;;  %v2639_v55 = vld [vmem:[%s7880_s9 + $0x78] sm:$0xff]  ;;  %v2632_v50 = vld [vmem:[%s7880_s9 + $0x40] sm:$0xff] }
 0x58e   :  { %v2503_v36 = vadd.f32 %v2502_v23, %v2501_v11  ;;  %6271 = vmatprep.subr.mxu1 %v2630_v47  ;;  %6259 = vmatprep.subr.mxu0 %v2625_v14 }
 0x58f   :  { %6272 = vmatpush3.msra.mxu1 %v2630_v47  ;;  %6260 = vmatpush3.msra.mxu0 %v2625_v14  ;;  %v2636_v47 = vld [vmem:[%s7880_s9 + $0x60] sm:$0xff] }
 0x590   :  { %6273 = vmatprep.subr.mxu1 %v2629_v16  ;;  %6261 = vmatprep.subr.mxu0 %v2624_v19 }
 0x591   :  { %v6246_v34 = vpop.f32.mrf.mxu0  ;;  %6274 = vmatpush3.msra.mxu1 %v2629_v16  ;;  %6262 = vmatpush3.msra.mxu0 %v2624_v19  ;;  %v2994_v19 = vld [vmem:[%s7881_s10 + $0x10] sm:$0xff] }
 0x592   :  { %v6251_v54 = vpop.f32.mrf.mxu1  ;;  %v2523_v22 = vsel %vm69_vm0, %v6246_v34, 0.0  ;;  %6275 = vmatprep.subr.mxu1 %v2628_v20  ;;  %6283 = vmatprep.subr.mxu0 %v2635_v12 }
 0x593   :  { %v2511_v35 = vsel %vm69_vm0, %v6251_v54, 0.0  ;;  %v2393_v37 = vpop.f32.mrf.mxu0  ;;  %v2524_v31 = vadd.f32 %v2523_v22, %v2522_v29  ;;  %6276 = vmatpush3.msra.mxu1 %v2628_v20  ;;  %v2997_v20 = vld [vmem:[%s7881_s10 + $0x28] sm:$0xff] }
 0x594   :  { %v2512_v25 = vadd.f32 %v2511_v35, %v2510_v63  ;;  %v2480_v26 = vpop.f32.mrf.mxu1  ;;  %v2516_v40 = vsel %vm69_vm0, %v2393_v37, 0.0  ;;  %6297 = vmatprep.subr.mxu1 %v2639_v55 }
 0x595   :  { %v2504_v38 = vsel %vm69_vm0, %v2480_v26, 0.0  ;;  %v2517_v48 = vadd.f32 %v2516_v40, %v2515_v18 }
 0x596   :  { %v2535_v28 = vadd.f32 %v5708_v27, %v2512_v25  ;;  %v2505_v17 = vadd.f32 %v2504_v38, %v2503_v36  ;;  %v6254_v39 = vpop.f32.mrf.mxu1 }
 0x597   :  { %v2525_v21 = vsel %vm69_vm0, %v6254_v39, 0.0 }
 0x598   :  { %v7283_v44 = vadd.f32 %v6663_v41, %v2535_v28  ;;  %v2534_v45 = vadd.f32 %v5708_v27, %v2505_v17  ;;  %v2526_v42 = vadd.f32 %v2525_v21, %v2524_v31  ;;  %v2490_v43 = vpop.f32.mrf.mxu1 }
 0x599   :  { %v2518_v46 = vsel %vm69_vm0, %v2490_v43, 0.0 }
 0x59a   :  { %v7289_v51 = vadd.f32 %v6664_v49, %v2534_v45  ;;  %v2537_v52 = vadd.f32 %v5708_v27, %v2526_v42  ;;  %v2545_v53 = vsel %vm69_vm0, %v7283_v44, 0.0  ;;  %v2519_v58 = vadd.f32 %v2518_v46, %v2517_v48  ;;  %v5709_v49 = vld [vmem:[%s7878_s7] ss:$0 sm:$0xff] }
 0x59b   :  { %2546 = vadd.xlane.f32.xlu1 %v2545_v53  ;;  %v2559_v60 = vmul.f32 %v7283_v44, %v7283_v44 }
 0x59c   :  { %v7296_v57 = vadd.f32 %v6665_v56, %v2537_v52  ;;  %v2542_v59 = vsel %vm69_vm0, %v7289_v51, 0.0  ;;  %v2536_v0 = vadd.f32 %v5708_v27, %v2519_v58  ;;  %v2558_v3 = vmul.f32 %v7289_v51, %v7289_v51 }
 0x59d   :  { %2543 = vadd.xlane.f32.xlu0 %v2542_v59  ;;  %v2565_v2 = vsel %vm69_vm0, %v2559_v60, 0.0  ;;  %v5710_v60 = vld [vmem:[%s7879_s8] ss:$0 sm:$0xff] }
 0x59e   :  { %v2551_v61 = vsel %vm69_vm0, %v7296_v57, 0.0  ;;  %v2561_v62 = vmul.f32 %v7296_v57, %v7296_v57  ;;  %v7313_v5 = vadd.f32 %v6666_v33, %v2536_v0  ;;  %v2562_v32 = vsel %vm69_vm0, %v2558_v3, 0.0  ;;  %v2638_v33 = vld [vmem:[%s7880_s9 + $0x70] sm:$0xff] }
 0x59f   :  { %2552 = vadd.xlane.f32.xlu1 %v2551_v61 }
 0x5a0   :  { %v2571_v4 = vsel %vm69_vm0, %v2561_v62, 0.0  ;;  %v2548_v1 = vsel %vm69_vm0, %v7313_v5, 0.0  ;;  %v2560_v6 = vmul.f32 %v7313_v5, %v7313_v5 }
 0x5a1   :  { %2566 = vadd.xlane.f32.xlu0 %v2565_v2 }
 0x5a2   :  { %v2568_v8 = vsel %vm69_vm0, %v2560_v6, 0.0  ;;  %v2633_v6 = vld [vmem:[%s7880_s9 + $0x48] sm:$0xff] }
 0x5a3   :  { %2572 = vadd.xlane.f32.xlu1 %v2571_v4  ;;  %v2634_v4 = vld [vmem:[%s7880_s9 + $0x50] sm:$0xff] }
 0x5a5   :  { %2563 = vadd.xlane.f32.xlu0 %v2562_v32 }
 0x5a9   :  { %2549 = vadd.xlane.f32.xlu0 %v2548_v1 }
 0x5ad   :  { %2569 = vadd.xlane.f32.xlu0 %v2568_v8  ;;  %v2637_v8 = vld [vmem:[%s7880_s9 + $0x68] sm:$0xff] }
 0x624   :  { %v2547_v13 = vpop.xlane.xlu1 %2546 }
 0x625   :  { %v2555_v23 = vmul.f32 0.03125, %v2547_v13  ;;  %v67_v13 = vld [vmem:[%s7900_s29] sm:$0xff] }
 0x626   :  { %v2544_v24 = vpop.xlane.xlu0 %2543 }
 0x627   :  { %v2579_v54 = vmul.f32 %v2555_v23, %v2555_v23  ;;  %v2554_v7 = vmul.f32 0.03125, %v2544_v24  ;;  %v2587_v43 = vsub.f32 %v7283_v44, %v2555_v23  ;;  %v2992_v24 = vld [vmem:[%s7881_s10] sm:$0xff]  ;;  %v2995_v23 = vld [vmem:[%s7881_s10 + $0x18] sm:$0xff] }
 0x628   :  { %v2553_v34 = vpop.xlane.xlu1 %2552 }
 0x629   :  { %v2557_v11 = vmul.f32 0.03125, %v2553_v34  ;;  %v2578_v37 = vmul.f32 %v2554_v7, %v2554_v7  ;;  %v2586_v48 = vsub.f32 %v7289_v51, %v2554_v7  ;;  %v68_v34 = vld [vmem:[%s7900_s29 + $0x8] sm:$0xff]  ;;  %v2998_v7 = vld [vmem:[%s7881_s10 + $0x30] sm:$0xff] }
 0x62a   :  { %v2567_v63 = vpop.xlane.xlu0 %2566 }
 0x62b   :  { %v2575_v22 = vmul.f32 0.03125, %v2567_v63  ;;  %v2581_v36 = vmul.f32 %v2557_v11, %v2557_v11  ;;  %v2589_v61 = vsub.f32 %v7296_v57, %v2557_v11  ;;  %v3000_v11 = vld [vmem:[%s7881_s10 + $0x40] sm:$0xff]  ;;  %v2999_v63 = vld [vmem:[%s7881_s10 + $0x38] sm:$0xff] }
 0x62c   :  { %v2573_v35 = vpop.xlane.xlu1 %2572 }
 0x62d   :  { %v2583_v27 = vsub.f32 %v2575_v22, %v2579_v54  ;;  %v2577_v29 = vmul.f32 0.03125, %v2573_v35  ;;  %v3003_v54 = vld [vmem:[%s7881_s10 + $0x58] sm:$0xff]  ;;  %v3002_v22 = vld [vmem:[%s7881_s10 + $0x50] sm:$0xff]  ;;  %v3001_v35 = vld [vmem:[%s7881_s10 + $0x48] sm:$0xff] }
 0x62e   :  { %v2564_v25 = vpop.xlane.xlu0 %2563 }
 0x62f   :  { %v2591_v26 = vadd.f32 1e-05, %v2583_v27  ;;  %v2574_v15 = vmul.f32 0.03125, %v2564_v25  ;;  %v2585_v38 = vsub.f32 %v2577_v29, %v2581_v36 }
 0x631   :  { %6575 = vrsqrt.f32 %v2591_v26  ;;  %v2582_v31 = vsub.f32 %v2574_v15, %v2578_v37  ;;  %v2593_v30 = vadd.f32 1e-05, %v2585_v38 }
 0x632   :  { %v2550_v28 = vpop.xlane.xlu0 %2549 }
 0x633   :  { %v2590_v17 = vadd.f32 1e-05, %v2582_v31  ;;  %v2556_v39 = vmul.f32 0.03125, %v2550_v28 }
 0x635   :  { %6577 = vrsqrt.f32 %v2590_v17  ;;  %v2580_v21 = vmul.f32 %v2556_v39, %v2556_v39  ;;  %v2588_v3 = vsub.f32 %v7313_v5, %v2556_v39 }
 0x636   :  { %v2570_v40 = vpop.xlane.xlu0 %2569  ;;  %6579 = vrsqrt.f32 %v2593_v30 }
 0x637   :  { %v2576_v18 = vmul.f32 0.03125, %v2570_v40 }
 0x639   :  { %v2584_v41 = vsub.f32 %v2576_v18, %v2580_v21 }
 0x63b   :  { %v2592_v45 = vadd.f32 1e-05, %v2584_v41 }
 0x63d   :  { %6581 = vrsqrt.f32 %v2592_v45 }
 0x63e   :  { %v6576_v42 = vpop.eup %6575 }
 0x63f   :  { %v2599_v46 = vmul.f32 %v6576_v42, %v2587_v43 }
 0x641   :  { %v2610_v56 = vmul.f32 %v5709_v49, %v2599_v46 }
 0x642   :  { %v6578_v52 = vpop.eup %6577 }
 0x643   :  { %v2598_v53 = vmul.f32 %v6578_v52, %v2586_v48  ;;  %v6580_v58 = vpop.eup %6579  ;;  %v2621_v0 = vadd.f32 %v5710_v60, %v2610_v56 }
 0x644   :  { %v2601_v2 = vmul.f32 %v6580_v58, %v2589_v61 }
 0x645   :  { %v2609_v59 = vmul.f32 %v5709_v49, %v2598_v53 }
 0x646   :  { %v2612_v9 = vmul.f32 %v5709_v49, %v2601_v2 }
 0x647   :  { %v2620_v62 = vadd.f32 %v5710_v60, %v2609_v59 }
 0x648   :  { %v2623_v16 = vadd.f32 %v5710_v60, %v2612_v9 }
 0x649   :  { %6263 = vmatprep.mubr.msk.f32.mxu0 %vm69_vm0, %v2620_v62  ;;  %6277 = vmatprep.mubr.msk.f32.mxu1 %vm69_vm0, %v2620_v62 }
 0x64a   :  { %v6582_v32 = vpop.eup %6581  ;;  %6264 = vmatmul.mubr.msk.f32.vlgmr.msra.gmra.mxu0 %vm69_vm0, %v2621_v0  ;;  %6278 = vmatmul.mubr.msk.f32.vlgmr.msra.gmra.mxu1 %vm69_vm0, %v2621_v0 }
 0x64b   :  { %6284 = vmatpush3.msra.mxu0 %v2635_v12  ;;  %6298 = vmatpush3.msra.mxu1 %v2639_v55  ;;  %v2600_v1 = vmul.f32 %v6582_v32, %v2588_v3  ;;  %v2993_v12 = vld [vmem:[%s7881_s10 + $0x8] sm:$0xff]  ;;  %v2996_v55 = vld [vmem:[%s7881_s10 + $0x20] sm:$0xff] }
 0x64c   :  { %6285 = vmatprep.subr.mxu0 %v2634_v4  ;;  %6299 = vmatprep.subr.mxu1 %v2638_v33 }
 0x64d   :  { %v2611_v10 = vmul.f32 %v5709_v49, %v2600_v1  ;;  %6286 = vmatpush3.msra.mxu0 %v2634_v4  ;;  %6300 = vmatpush3.msra.mxu1 %v2638_v33 }
 0x64e   :  { %6287 = vmatprep.subr.mxu0 %v2633_v6  ;;  %6301 = vmatprep.subr.mxu1 %v2637_v8 }
 0x64f   :  { %v2622_v14 = vadd.f32 %v5710_v60, %v2611_v10  ;;  %6288 = vmatpush3.msra.mxu0 %v2633_v6  ;;  %6302 = vmatpush3.msra.mxu1 %v2637_v8 }
 0x650   :  { %6289 = vmatprep.subr.mxu0 %v2632_v50  ;;  %6303 = vmatprep.subr.mxu1 %v2636_v47 }
 0x651   :  { %6266 = vmatprep.mubr.msk.f32.mxu0 %vm69_vm0, %v2622_v14  ;;  %6280 = vmatprep.mubr.msk.f32.mxu1 %vm69_vm0, %v2622_v14 }
 0x652   :  { %6267 = vmatmul.mubr.msk.f32.gmra.mxu0 %vm69_vm0, %v2623_v16  ;;  %6281 = vmatmul.mubr.msk.f32.gmra.mxu1 %vm69_vm0, %v2623_v16 }
 0x653   :  { %6291 = vmatprep.mubr.msk.f32.mxu0 %vm69_vm0, %v2620_v62  ;;  %6305 = vmatprep.mubr.msk.f32.mxu1 %vm69_vm0, %v2620_v62 }
 0x654   :  { %6290 = vmatpush3.msra.mxu0 %v2632_v50  ;;  %6304 = vmatpush3.msra.mxu1 %v2636_v47 }
 0x655   :  { %6311 = vmatprep.subr.mxu0 %v2994_v19  ;;  %6320 = vmatprep.subr.mxu1 %v2997_v20 }
 0x656   :  { %6292 = vmatmul.mubr.msk.f32.vlgmr.msra.gmra.mxu0 %vm69_vm0, %v2621_v0  ;;  %6306 = vmatmul.mubr.msk.f32.vlgmr.msra.gmra.mxu1 %vm69_vm0, %v2621_v0 }
 0x657   :  { %6294 = vmatprep.mubr.msk.f32.mxu0 %vm69_vm0, %v2622_v14  ;;  %6308 = vmatprep.mubr.msk.f32.mxu1 %vm69_vm0, %v2622_v14 }
 0x658   :  { %6312 = vmatpush3.msra.mxu0 %v2994_v19  ;;  %6321 = vmatpush3.msra.mxu1 %v2997_v20 }
 0x659   :  { %6313 = vmatprep.subr.mxu0 %v2993_v12  ;;  %6322 = vmatprep.subr.mxu1 %v2996_v55 }
 0x65a   :  { %6295 = vmatmul.mubr.msk.f32.gmra.mxu0 %vm69_vm0, %v2623_v16  ;;  %6309 = vmatmul.mubr.msk.f32.gmra.mxu1 %vm69_vm0, %v2623_v16 }
 0x65b   :  { %6314 = vmatpush3.msra.mxu0 %v2993_v12  ;;  %6317 = vmatprep.mubr.msk.f32.mxu0 %vm3004_vm3, %v67_v13 }
 0x65c   :  { %6315 = vmatprep.subr.mxu0 %v2992_v24  ;;  %6323 = vmatpush3.msra.mxu1 %v2996_v55 }
 0x65d   :  { %6316 = vmatpush3.msra.mxu0 %v2992_v24  ;;  %6324 = vmatprep.subr.mxu1 %v2995_v23 }
 0x65e   :  { %6318 = vmatmul.mubr.msk.f32.vlgmr.msra.gmra.mxu0 %vm3004_vm3, %v68_v34  ;;  %6325 = vmatpush3.msra.mxu1 %v2995_v23 }
 0x65f   :  { %6326 = vmatprep.mubr.msk.f32.mxu1 %vm3004_vm3, %v67_v13  ;;  %6329 = vmatprep.subr.mxu0 %v3000_v11 }
 0x660   :  { %6327 = vmatmul.mubr.msk.f32.vlgmr.msra.gmra.mxu1 %vm3004_vm3, %v68_v34  ;;  %6330 = vmatpush3.msra.mxu0 %v3000_v11 }
 0x661   :  { %6331 = vmatprep.subr.mxu0 %v2999_v63  ;;  %6338 = vmatprep.subr.mxu1 %v3003_v54 }
 0x662   :  { %6332 = vmatpush3.msra.mxu0 %v2999_v63  ;;  %6335 = vmatprep.mubr.msk.f32.mxu0 %vm3004_vm3, %v67_v13 }
 0x663   :  { %6333 = vmatprep.subr.mxu0 %v2998_v7  ;;  %6339 = vmatpush3.msra.mxu1 %v3003_v54 }
 0x664   :  { %6334 = vmatpush3.msra.mxu0 %v2998_v7  ;;  %6340 = vmatprep.subr.mxu1 %v3002_v22 }
 0x665   :  { %6336 = vmatmul.mubr.msk.f32.vlgmr.msra.gmra.mxu0 %vm3004_vm3, %v68_v34  ;;  %6341 = vmatpush3.msra.mxu1 %v3002_v22 }
 0x666   :  { %6342 = vmatprep.subr.mxu1 %v3001_v35  ;;  %6344 = vmatprep.mubr.msk.f32.mxu1 %vm3004_vm3, %v67_v13 }
 0x667   :  { %6343 = vmatpush3.msra.mxu1 %v3001_v35 }
 0x668   :  { %6345 = vmatmul.mubr.msk.f32.vlgmr.msra.gmra.mxu1 %vm3004_vm3, %v68_v34 }
 0x70a   :  { %v6265_v27 = vpop.f32.mrf.mxu0  ;;  %v6279_v29 = vpop.f32.mrf.mxu1 }
 0x70c   :  { %v2718_v36 = vpop.f32.mrf.mxu0  ;;  %v2803_v25 = vpop.f32.mrf.mxu1 }
 0x70d   :  { %6349 = vmatprep.mubr.msk.f32.mxu0 %vm527_vm1, %v2718_v36 }
 0x712   :  { %v6268_v37 = vpop.f32.mrf.mxu0  ;;  %v6282_v26 = vpop.f32.mrf.mxu1 }
 0x714   :  { %v2728_v15 = vpop.f32.mrf.mxu0  ;;  %v2813_v38 = vpop.f32.mrf.mxu1 }
 0x715   :  { %6354 = vmatprep.mubr.msk.f32.mxu1 %vm527_vm1, %v2728_v15 }
 0x716   :  { %v6293_v31 = vpop.f32.mrf.mxu0  ;;  %v6307_v28 = vpop.f32.mrf.mxu1 }
 0x718   :  { %v2888_v17 = vpop.f32.mrf.mxu0  ;;  %v2973_v39 = vpop.f32.mrf.mxu1 }
 0x71a   :  { %v6296_v30 = vpop.f32.mrf.mxu0  ;;  %v6310_v40 = vpop.f32.mrf.mxu1 }
 0x71c   :  { %v2898_v21 = vpop.f32.mrf.mxu0  ;;  %v2983_v18 = vpop.f32.mrf.mxu1 }
 0x71e   :  { %v7447_v41 = vpop.f32.mrf.mxu0 }
 0x71f   :  { %6352 = vmatprep.subr.msk.mxu1 %vm527_vm1, %v7447_v41 }
 0x720   :  { %v7451_v45 = vpop.f32.mrf.mxu0  ;;  %v7453_v42 = vpop.f32.mrf.mxu1  ;;  %6353 = vmatpush3.xpose.msk.msra.mxu1 %vm527_vm1, %v7447_v41 }
 0x721   :  { %6347 = vmatprep.subr.msk.mxu0 %vm527_vm1, %v7451_v45  ;;  %6362 = vmatprep.subr.msk.mxu1 %vm527_vm1, %v7453_v42 }
 0x722   :  { %v7461_v43 = vpop.f32.mrf.mxu1  ;;  %6348 = vmatpush3.xpose.msk.msra.mxu0 %vm527_vm1, %v7451_v45 }
 0x723   :  { %6355 = vmatmul.mubr.msk.f32.vlgmr.msra.gmra.mxu1 %vm527_vm1, %v6268_v37  ;;  %6357 = vmatprep.subr.msk.mxu0 %vm527_vm1, %v7461_v43 }
 0x724   :  { %6363 = vmatpush3.xpose.msk.msra.mxu1 %vm527_vm1, %v7453_v42  ;;  %6364 = vmatprep.mubr.msk.f32.mxu1 %vm527_vm1, %v2813_v38 }
 0x725   :  { %6350 = vmatmul.mubr.msk.f32.vlgmr.msra.gmra.mxu0 %vm527_vm1, %v6265_v27  ;;  %v7472_v46 = vpop.f32.mrf.mxu0 }
 0x726   :  { %6358 = vmatpush3.xpose.msk.msra.mxu0 %vm527_vm1, %v7461_v43  ;;  %6359 = vmatprep.mubr.msk.f32.mxu0 %vm527_vm1, %v2803_v25 }
 0x727   :  { %6365 = vmatmul.mubr.msk.f32.vlgmr.msra.gmra.mxu1 %vm527_vm1, %v6282_v26  ;;  %6372 = vmatprep.subr.msk.mxu1 %vm527_vm1, %v7472_v46  ;;  %v7480_v48 = vpop.f32.mrf.mxu0 }
 0x728   :  { %6373 = vmatpush3.xpose.msk.msra.mxu1 %vm527_vm1, %v7472_v46  ;;  %6374 = vmatprep.mubr.msk.f32.mxu1 %vm527_vm1, %v2898_v21  ;;  %v7485_v49 = vpop.f32.mrf.mxu1 }
 0x729   :  { %6360 = vmatmul.mubr.msk.f32.vlgmr.msra.gmra.mxu0 %vm527_vm1, %v6279_v29  ;;  %6367 = vmatprep.subr.msk.mxu0 %vm527_vm1, %v7480_v48 }
 0x72a   :  { %6368 = vmatpush3.xpose.msk.msra.mxu0 %vm527_vm1, %v7480_v48  ;;  %6369 = vmatprep.mubr.msk.f32.mxu0 %vm527_vm1, %v2888_v17  ;;  %v7493_v52 = vpop.f32.mrf.mxu1 }
 0x72b   :  { %6375 = vmatmul.mubr.msk.f32.vlgmr.msra.gmra.mxu1 %vm527_vm1, %v6296_v30  ;;  %6382 = vmatprep.subr.msk.mxu1 %vm527_vm1, %v7485_v49 }
 0x72c   :  { %6383 = vmatpush3.xpose.msk.msra.mxu1 %vm527_vm1, %v7485_v49  ;;  %6384 = vmatprep.mubr.msk.f32.mxu1 %vm527_vm1, %v2983_v18 }
 0x72d   :  { %6370 = vmatmul.mubr.msk.f32.vlgmr.msra.gmra.mxu0 %vm527_vm1, %v6293_v31  ;;  %6377 = vmatprep.subr.msk.mxu0 %vm527_vm1, %v7493_v52 }
 0x72e   :  { %6378 = vmatpush3.xpose.msk.msra.mxu0 %vm527_vm1, %v7493_v52  ;;  %6379 = vmatprep.mubr.msk.f32.mxu0 %vm527_vm1, %v2973_v39 }
 0x72f   :  { %6385 = vmatmul.mubr.msk.f32.vlgmr.msra.gmra.mxu1 %vm527_vm1, %v6310_v40 }
 0x731   :  { %6380 = vmatmul.mubr.msk.f32.vlgmr.msra.gmra.mxu0 %vm527_vm1, %v6307_v28 }
 0x7e3   :  { %v6356_v53 = vpop.f32.mrf.mxu1 }
 0x7e4   :  { %v3992_v56 = vsel %vm527_vm1, %v6356_v53, -inf }
 0x7e5   :  { %3993 = vmax.xlane.f32.xlu0 %v3992_v56  ;;  %v6351_v58 = vpop.f32.mrf.mxu0  ;;  %v3470_v59 = vpop.f32.mrf.mxu1 }
 0x7e6   :  { %v3986_v60 = vsel %vm527_vm1, %v6351_v58, -inf  ;;  %v3989_v0 = vsel %vm527_vm1, %v3470_v59, -inf }
 0x7e7   :  { %v7511_v61 = vpop.f32.mrf.mxu1  ;;  %3987 = vmax.xlane.f32.xlu1 %v3986_v60  ;;  %v7513_v62 = vpop.f32.mrf.mxu0 }
 0x7e8   :  { %v3983_v32 = vsel %vm527_vm1, %v7513_v62, -inf  ;;  %v4004_v9 = vsel %vm527_vm1, %v7511_v61, -inf }
 0x7e9   :  { %3990 = vmax.xlane.f32.xlu0 %v3989_v0  ;;  %v6361_v2 = vpop.f32.mrf.mxu0  ;;  %v7517_v4 = vpop.f32.mrf.mxu1 }
 0x7ea   :  { %v3998_v3 = vsel %vm527_vm1, %v6361_v2, -inf  ;;  %v4001_v47 = vsel %vm527_vm1, %v7517_v4, -inf }
 0x7eb   :  { %3999 = vmax.xlane.f32.xlu1 %v3998_v3  ;;  %v3554_v33 = vpop.f32.mrf.mxu0  ;;  %v7524_v8 = vpop.f32.mrf.mxu1 }
 0x7ec   :  { %v3995_v6 = vsel %vm527_vm1, %v3554_v33, -inf  ;;  %v4016_v50 = vsel %vm527_vm1, %v7524_v8, -inf }
 0x7ed   :  { %3984 = vmax.xlane.f32.xlu0 %v3983_v32  ;;  %v7521_v1 = vpop.f32.mrf.mxu0  ;;  %v7534_v14 = vpop.f32.mrf.mxu1 }
 0x7ee   :  { %v4010_v19 = vsel %vm527_vm1, %v7521_v1, -inf  ;;  %v4013_v20 = vsel %vm527_vm1, %v7534_v14, -inf }
 0x7ef   :  { %3996 = vmax.xlane.f32.xlu1 %v3995_v6  ;;  %v7528_v10 = vpop.f32.mrf.mxu0  ;;  %v7542_v12 = vpop.f32.mrf.mxu1 }
 0x7f0   :  { %v4007_v13 = vsel %vm527_vm1, %v7528_v10, -inf  ;;  %v4028_v63 = vsel %vm527_vm1, %v7542_v12, -inf }
 0x7f1   :  { %4005 = vmax.xlane.f32.xlu0 %v4004_v9  ;;  %v7536_v16 = vpop.f32.mrf.mxu0  ;;  %v7550_v23 = vpop.f32.mrf.mxu1 }
 0x7f2   :  { %v4022_v34 = vsel %vm527_vm1, %v7536_v16, -inf  ;;  %v4025_v11 = vsel %vm527_vm1, %v7550_v23, -inf }
 0x7f3   :  { %4017 = vmax.xlane.f32.xlu1 %v4016_v50  ;;  %v7544_v55 = vpop.f32.mrf.mxu0 }
 0x7f4   :  { %v4019_v24 = vsel %vm527_vm1, %v7544_v55, -inf }
 0x7f5   :  { %4002 = vmax.xlane.f32.xlu0 %v4001_v47 }
 0x7f7   :  { %4011 = vmax.xlane.f32.xlu1 %v4010_v19 }
 0x7f9   :  { %4014 = vmax.xlane.f32.xlu0 %v4013_v20 }
 0x7fb   :  { %4008 = vmax.xlane.f32.xlu1 %v4007_v13 }
 0x7fd   :  { %4020 = vmax.xlane.f32.xlu0 %v4019_v24 }
 0x7ff   :  { %4023 = vmax.xlane.f32.xlu1 %v4022_v34 }
 0x801   :  { %4026 = vmax.xlane.f32.xlu0 %v4025_v11 }
 0x803   :  { %4029 = vmax.xlane.f32.xlu1 %v4028_v63 }
 0x814   :  { %4243 = vrot.lane.b32.xlu1 %v7447_v41, %s6689_s22 }
 0x817   :  { %4159 = vrot.lane.b32.xlu0 %v7451_v45, %s6689_s22 }
 0x818   :  { %4327 = vrot.lane.b32.xlu1 %v7461_v43, %s6689_s22 }
 0x81b   :  { %4495 = vrot.lane.b32.xlu0 %v7480_v48, %s6689_s22 }
 0x81c   :  { %4411 = vrot.lane.b32.xlu1 %v7453_v42, %s6689_s22 }
 0x820   :  { %4663 = vrot.lane.b32.xlu1 %v7493_v52, %s6689_s22 }
 0x86e   :  { %v3994_v54 = vpop.xlane.xlu0 %3993 }
 0x86f   :  { %v4034_v7 = vsub.f32 %v6356_v53, %v3994_v54 }
 0x870   :  { %v3988_v22 = vpop.xlane.xlu1 %3987 }
 0x871   :  { %v4053_v35 = vmul.f32 1.442695, %v4034_v7  ;;  %v4032_v27 = vsub.f32 %v6351_v58, %v3988_v22 }
 0x872   :  { %v3991_v29 = vpop.xlane.xlu0 %3990 }
 0x873   :  { %6583 = vpow2.f32 %v4053_v35  ;;  %v4049_v36 = vmul.f32 1.442695, %v4032_v27  ;;  %v4033_v25 = vsub.f32 %v3470_v59, %v3991_v29 }
 0x874   :  { %v4000_v37 = vpop.xlane.xlu1 %3999 }
 0x875   :  { %6585 = vpow2.f32 %v4049_v36  ;;  %v4051_v26 = vmul.f32 1.442695, %v4033_v25  ;;  %v4036_v15 = vsub.f32 %v6361_v2, %v4000_v37 }
 0x876   :  { %v3985_v38 = vpop.xlane.xlu0 %3984 }
 0x877   :  { %6587 = vpow2.f32 %v4051_v26  ;;  %v4057_v31 = vmul.f32 1.442695, %v4036_v15  ;;  %v4031_v28 = vsub.f32 %v7513_v62, %v3985_v38 }
 0x878   :  { %v3997_v17 = vpop.xlane.xlu1 %3996 }
 0x879   :  { %6589 = vpow2.f32 %v4057_v31  ;;  %v4047_v39 = vmul.f32 1.442695, %v4031_v28  ;;  %v4035_v30 = vsub.f32 %v3554_v33, %v3997_v17 }
 0x87a   :  { %v4006_v40 = vpop.xlane.xlu0 %4005 }
 0x87b   :  { %6591 = vpow2.f32 %v4047_v39  ;;  %v4055_v21 = vmul.f32 1.442695, %v4035_v30  ;;  %v4038_v18 = vsub.f32 %v7511_v61, %v4006_v40 }
 0x87c   :  { %v4018_v41 = vpop.xlane.xlu1 %4017 }
 0x87d   :  { %6593 = vpow2.f32 %v4055_v21  ;;  %v4061_v45 = vmul.f32 1.442695, %v4038_v18  ;;  %v4042_v42 = vsub.f32 %v7524_v8, %v4018_v41 }
 0x87e   :  { %v4003_v43 = vpop.xlane.xlu0 %4002 }
 0x87f   :  { %6595 = vpow2.f32 %v4061_v45  ;;  %v4069_v48 = vmul.f32 1.442695, %v4042_v42  ;;  %v4037_v52 = vsub.f32 %v7517_v4, %v4003_v43 }
 0x880   :  { %v7574_v53 = vpop.eup %6583  ;;  %v4012_v56 = vpop.xlane.xlu1 %4011 }
 0x881   :  { %6597 = vpow2.f32 %v4069_v48  ;;  %v4059_v58 = vmul.f32 1.442695, %v4037_v52  ;;  %v4040_v59 = vsub.f32 %v7521_v1, %v4012_v56  ;;  %v4088_v60 = vsel %vm527_vm1, %v7574_v53, 0.0 }
 0x882   :  { %v7579_v61 = vpop.eup %6585  ;;  %v4015_v62 = vpop.xlane.xlu0 %4014  ;;  %4089 = vadd.xlane.f32.xlu0 %v4088_v60 }
 0x883   :  { %6599 = vpow2.f32 %v4059_v58  ;;  %v4065_v0 = vmul.f32 1.442695, %v4040_v59  ;;  %v4041_v2 = vsub.f32 %v7534_v14, %v4015_v62  ;;  %v4082_v3 = vsel %vm527_vm1, %v7579_v61, 0.0 }
 0x884   :  { %v7584_v4 = vpop.eup %6587  ;;  %v4009_v33 = vpop.xlane.xlu1 %4008  ;;  %4083 = vadd.xlane.f32.xlu1 %v4082_v3 }
 0x885   :  { %6601 = vpow2.f32 %v4065_v0  ;;  %v4067_v32 = vmul.f32 1.442695, %v4041_v2  ;;  %v4039_v1 = vsub.f32 %v7528_v10, %v4009_v33  ;;  %v4085_v6 = vsel %vm527_vm1, %v7584_v4, 0.0 }
 0x886   :  { %v7589_v8 = vpop.eup %6589  ;;  %4086 = vadd.xlane.f32.xlu0 %v4085_v6  ;;  %v4021_v9 = vpop.xlane.xlu0 %4020 }
 0x887   :  { %6603 = vpow2.f32 %v4067_v32  ;;  %v4063_v50 = vmul.f32 1.442695, %v4039_v1  ;;  %v4094_v47 = vsel %vm527_vm1, %v7589_v8, 0.0  ;;  %v4043_v19 = vsub.f32 %v7544_v55, %v4021_v9 }
 0x888   :  { %v7593_v14 = vpop.eup %6591  ;;  %4095 = vadd.xlane.f32.xlu1 %v4094_v47  ;;  %v4024_v20 = vpop.xlane.xlu1 %4023 }
 0x889   :  { %6605 = vpow2.f32 %v4063_v50  ;;  %v4079_v10 = vsel %vm527_vm1, %v7593_v14, 0.0  ;;  %v4044_v34 = vsub.f32 %v7536_v16, %v4024_v20  ;;  %v4071_v55 = vmul.f32 1.442695, %v4043_v19 }
 0x88a   :  { %v7598_v13 = vpop.eup %6593  ;;  %4080 = vadd.xlane.f32.xlu0 %v4079_v10  ;;  %v4027_v24 = vpop.xlane.xlu0 %4026 }
 0x88b   :  { %v4045_v11 = vsub.f32 %v7550_v23, %v4027_v24  ;;  %v4091_v63 = vsel %vm527_vm1, %v7598_v13, 0.0  ;;  %v4073_v36 = vmul.f32 1.442695, %v4044_v34 }
 0x88c   :  { %v7604_v54 = vpop.eup %6595  ;;  %4092 = vadd.xlane.f32.xlu1 %v4091_v63  ;;  %v4030_v7 = vpop.xlane.xlu1 %4029 }
 0x88d   :  { %v4075_v22 = vmul.f32 1.442695, %v4045_v11  ;;  %v4046_v35 = vsub.f32 %v7542_v12, %v4030_v7  ;;  %v4100_v27 = vsel %vm527_vm1, %v7604_v54, 0.0 }
 0x88e   :  { %v7609_v29 = vpop.eup %6597  ;;  %4101 = vadd.xlane.f32.xlu0 %v4100_v27  ;;  %v4160_v16 = vpop.permute.xlu0 %4159 }
 0x88f   :  { %6607 = vpow2.f32 %v4075_v22  ;;  %v4077_v23 = vmul.f32 1.442695, %v4046_v35  ;;  %6387 = vmatprep.subr.mxu0 %v4160_v16  ;;  %v4112_v25 = vsel %vm527_vm1, %v7609_v29, 0.0 }
 0x890   :  { %v7613_v37 = vpop.eup %6599  ;;  %6609 = vpow2.f32 %v4071_v55  ;;  %4113 = vadd.xlane.f32.xlu1 %v4112_v25  ;;  %v4244_v26 = vpop.permute.xlu1 %4243  ;;  %6388 = vmatpush3.msra.mxu0 %v4160_v16 }
 0x891   :  { %6611 = vpow2.f32 %v4077_v23  ;;  %6392 = vmatprep.subr.mxu1 %v4244_v26  ;;  %v4097_v12 = vsel %vm527_vm1, %v7613_v37, 0.0 }
 0x892   :  { %v7617_v15 = vpop.eup %6601  ;;  %6393 = vmatpush3.msra.mxu1 %v4244_v26  ;;  %4098 = vadd.xlane.f32.xlu0 %v4097_v12  ;;  %6613 = vpow2.f32 %v4073_v36  ;;  %v4496_v56 = vpop.permute.xlu0 %4495 }
 0x893   :  { %v4106_v38 = vsel %vm527_vm1, %v7617_v15, 0.0 }
 0x894   :  { %v7621_v31 = vpop.eup %6603  ;;  %4107 = vadd.xlane.f32.xlu1 %v4106_v38  ;;  %v7623_v28 = vpop.permute.xlu1 %4327 }
 0x895   :  { %6397 = vmatprep.subr.mxu0 %v7623_v28  ;;  %v4109_v17 = vsel %vm527_vm1, %v7621_v31, 0.0 }
 0x896   :  { %v7628_v39 = vpop.eup %6605  ;;  %4110 = vadd.xlane.f32.xlu0 %v4109_v17 }
 0x897   :  { %v4103_v30 = vsel %vm527_vm1, %v7628_v39, 0.0 }
 0x898   :  { %4104 = vadd.xlane.f32.xlu1 %v4103_v30  ;;  %v4412_v40 = vpop.permute.xlu1 %4411 }
 0x899   :  { %6402 = vmatprep.subr.mxu1 %v4412_v40 }
 0x89c   :  { %v7632_v21 = vpop.eup %6607  ;;  %v7652_v58 = vpop.permute.xlu1 %4663 }
 0x89d   :  { %v7634_v18 = vpop.eup %6609  ;;  %v4121_v41 = vsel %vm527_vm1, %v7632_v21, 0.0 }
 0x89e   :  { %v7638_v45 = vpop.eup %6611  ;;  %4122 = vadd.xlane.f32.xlu0 %v4121_v41  ;;  %v4115_v48 = vsel %vm527_vm1, %v7634_v18, 0.0  ;;  %v4832_v41 = vld [vmem:[%s7882_s11 + $0x8] sm:$0xff] }
 0x89f   :  { %v4124_v42 = vsel %vm527_vm1, %v7638_v45, 0.0  ;;  %v7642_v43 = vpop.eup %6613 }
 0x8a0   :  { %4125 = vadd.xlane.f32.xlu1 %v4124_v42  ;;  %v4118_v52 = vsel %vm527_vm1, %v7642_v43, 0.0 }
 0x8a2   :  { %4116 = vadd.xlane.f32.xlu0 %v4115_v48 }
 0x8a4   :  { %4119 = vadd.xlane.f32.xlu1 %v4118_v52 }
 0x8b5   :  { %4747 = vrot.lane.b32.xlu1 %v7485_v49, %s6689_s22 }
 0x8b8   :  { %4579 = vrot.lane.b32.xlu0 %v7472_v46, %s6689_s22 }
 0x90b   :  { %v4090_v59 = vpop.xlane.xlu0 %4089 }
 0x90c   :  { %6615 = vrcp.f32 %v4090_v59 }
 0x90d   :  { %v4084_v60 = vpop.xlane.xlu1 %4083 }
 0x90f   :  { %v4087_v62 = vpop.xlane.xlu0 %4086 }
 0x910   :  { %6617 = vrcp.f32 %v4087_v62 }
 0x911   :  { %v4096_v0 = vpop.xlane.xlu1 %4095  ;;  %6619 = vrcp.f32 %v4084_v60 }
 0x913   :  { %v4081_v2 = vpop.xlane.xlu0 %4080 }
 0x914   :  { %6621 = vrcp.f32 %v4081_v2 }
 0x915   :  { %v4093_v3 = vpop.xlane.xlu1 %4092 }
 0x916   :  { %6623 = vrcp.f32 %v4093_v3 }
 0x917   :  { %6625 = vrcp.f32 %v4096_v0  ;;  %v4102_v33 = vpop.xlane.xlu0 %4101 }
 0x918   :  { %6627 = vrcp.f32 %v4102_v33 }
 0x919   :  { %v4114_v49 = vpop.xlane.xlu1 %4113  ;;  %v6616_v46 = vpop.eup %6615 }
 0x91a   :  { %v4146_v47 = vmul.f32 %v6616_v46, %v7574_v53 }
 0x91b   :  { %v4099_v32 = vpop.xlane.xlu0 %4098 }
 0x91c   :  { %6629 = vrcp.f32 %v4099_v32 }
 0x91d   :  { %v6618_v1 = vpop.eup %6617  ;;  %v4108_v6 = vpop.xlane.xlu1 %4107  ;;  %6631 = vrcp.f32 %v4114_v49 }
 0x91e   :  { %v4145_v9 = vmul.f32 %v6618_v1, %v7584_v4  ;;  %v6620_v19 = vpop.eup %6619 }
 0x91f   :  { %v4111_v50 = vpop.xlane.xlu0 %4110  ;;  %v4144_v4 = vmul.f32 %v6620_v19, %v7579_v61 }
 0x920   :  { %6633 = vrcp.f32 %v4111_v50  ;;  %6394 = vmatprep.mubr.msk.f32.mxu1 %vm527_vm1, %v4145_v9 }
 0x921   :  { %v6622_v20 = vpop.eup %6621  ;;  %6635 = vrcp.f32 %v4108_v6  ;;  %v4105_v10 = vpop.xlane.xlu1 %4104  ;;  %6395 = vmatmul.mubr.msk.f32.vlgmr.msra.gmra.mxu1 %vm527_vm1, %v4146_v47 }
 0x922   :  { %6637 = vrcp.f32 %v4105_v10  ;;  %6403 = vmatpush3.msra.mxu1 %v4412_v40  ;;  %v4143_v24 = vmul.f32 %v6622_v20, %v7593_v14 }
 0x923   :  { %v6624_v34 = vpop.eup %6623 }
 0x924   :  { %v6626_v11 = vpop.eup %6625  ;;  %6389 = vmatprep.mubr.msk.f32.mxu0 %vm527_vm1, %v4143_v24  ;;  %v4147_v53 = vmul.f32 %v6624_v34, %v7598_v13 }
 0x925   :  { %6390 = vmatmul.mubr.msk.f32.vlgmr.msra.gmra.mxu0 %vm527_vm1, %v4144_v4  ;;  %v4148_v55 = vmul.f32 %v6626_v11, %v7589_v8  ;;  %v6628_v7 = vpop.eup %6627 }
 0x926   :  { %6398 = vmatpush3.msra.mxu0 %v7623_v28  ;;  %6399 = vmatprep.mubr.msk.f32.mxu0 %vm527_vm1, %v4147_v53  ;;  %v4150_v35 = vmul.f32 %v6628_v7, %v7604_v54 }
 0x927   :  { %6407 = vmatprep.subr.mxu0 %v4496_v56  ;;  %v4123_v63 = vpop.xlane.xlu0 %4122 }
 0x928   :  { %6639 = vrcp.f32 %v4123_v63 }
 0x929   :  { %v6630_v14 = vpop.eup %6629  ;;  %v4126_v22 = vpop.xlane.xlu1 %4125  ;;  %6400 = vmatmul.mubr.msk.f32.vlgmr.msra.gmra.mxu0 %vm527_vm1, %v4148_v55 }
 0x92a   :  { %6641 = vrcp.f32 %v4126_v22  ;;  %6408 = vmatpush3.msra.mxu0 %v4496_v56  ;;  %v4149_v61 = vmul.f32 %v6630_v14, %v7613_v37  ;;  %v6632_v27 = vpop.eup %6631 }
 0x92b   :  { %6417 = vmatprep.subr.mxu0 %v7652_v58  ;;  %v4117_v13 = vpop.xlane.xlu0 %4116  ;;  %v4154_v54 = vmul.f32 %v6632_v27, %v7609_v29 }
 0x92c   :  { %6643 = vrcp.f32 %v4117_v13  ;;  %6404 = vmatprep.mubr.msk.f32.mxu1 %vm527_vm1, %v4149_v61 }
 0x92d   :  { %v6634_v8 = vpop.eup %6633  ;;  %v4120_v16 = vpop.xlane.xlu1 %4119  ;;  %6405 = vmatmul.mubr.msk.f32.vlgmr.msra.gmra.mxu1 %vm527_vm1, %v4150_v35 }
 0x92e   :  { %v6636_v36 = vpop.eup %6635  ;;  %6645 = vrcp.f32 %v4120_v16  ;;  %v4153_v23 = vmul.f32 %v6634_v8, %v7621_v31 }
 0x92f   :  { %v6638_v25 = vpop.eup %6637  ;;  %v4580_v26 = vpop.permute.xlu0 %4579  ;;  %v4152_v38 = vmul.f32 %v6636_v36, %v7617_v15 }
 0x930   :  { %6412 = vmatprep.subr.mxu1 %v4580_v26  ;;  %6414 = vmatprep.mubr.msk.f32.mxu1 %vm527_vm1, %v4153_v23  ;;  %v4151_v37 = vmul.f32 %v6638_v25, %v7628_v39 }
 0x931   :  { %v4748_v12 = vpop.permute.xlu1 %4747  ;;  %6413 = vmatpush3.msra.mxu1 %v4580_v26 }
 0x932   :  { %6409 = vmatprep.mubr.msk.f32.mxu0 %vm527_vm1, %v4151_v37  ;;  %6415 = vmatmul.mubr.msk.f32.vlgmr.msra.gmra.mxu1 %vm527_vm1, %v4154_v54 }
 0x933   :  { %6422 = vmatprep.subr.mxu1 %v4748_v12  ;;  %6410 = vmatmul.mubr.msk.f32.vlgmr.msra.gmra.mxu0 %vm527_vm1, %v4152_v38 }
 0x934   :  { %6418 = vmatpush3.msra.mxu0 %v7652_v58  ;;  %6423 = vmatpush3.msra.mxu1 %v4748_v12 }
 0x935   :  { %v6640_v31 = vpop.eup %6639  ;;  %6435 = vmatprep.subr.mxu1 %v4832_v41 }
 0x936   :  { %v4157_v28 = vmul.f32 %v6640_v31, %v7632_v21  ;;  %v4831_v21 = vld [vmem:[%s7882_s11] sm:$0xff] }
 0x937   :  { %v6642_v17 = vpop.eup %6641  ;;  %6427 = vmatprep.subr.mxu0 %v4831_v21 }
 0x938   :  { %6424 = vmatprep.mubr.msk.f32.mxu1 %vm527_vm1, %v4157_v28  ;;  %v4158_v29 = vmul.f32 %v6642_v17, %v7638_v45  ;;  %v4834_v45 = vld [vmem:[%s7882_s11 + $0x18] sm:$0xff]  ;;  %v5791_v28 = vld [vmem:[%s7883_s12] ss:$0 sm:$0xff]  ;;  %s6692_s12 = smov [#allocation2]  }
 0x939   :  { %v6644_v39 = vpop.eup %6643  ;;  %s5615_s1 = sshll.u32 %s6692_s12, 4  ;;  %s5616_s1 = int_to_ptr.vmem [resolvable:$true] %s5615_s1 }
 0x93a   :  { %6425 = vmatmul.mubr.msk.f32.vlgmr.msra.gmra.mxu1 %vm527_vm1, %v4158_v29  ;;  %v4155_v15 = vmul.f32 %v6644_v39, %v7634_v18  ;;  %v4833_v18 = vld [vmem:[%s7882_s11 + $0x10] sm:$0xff]  ;;  %p6672_p1 = scmp.lt.s32.totalorder %s5616_s1, %s5616_s1 }
 0x93b   :  { %v6646_v30 = vpop.eup %6645  ;;  %6436 = vmatpush3.msra.mxu1 %v4832_v41 }
 0x93c   :  { %6419 = vmatprep.mubr.msk.f32.mxu0 %vm527_vm1, %v4155_v15  ;;  %v4156_v40 = vmul.f32 %v6646_v30, %v7642_v43  ;;  %6451 = vmatprep.subr.mxu1 %v4834_v45 }
 0x93e   :  { %6420 = vmatmul.mubr.msk.f32.vlgmr.msra.gmra.mxu0 %vm527_vm1, %v4156_v40 }
 0x93f   :  { %6428 = vmatpush3.msra.mxu0 %v4831_v21 }
 0x940   :  { %6443 = vmatprep.subr.mxu0 %v4833_v18 }
 0x9e1   :  { %v6396_v42 = vpop.f32.mrf.mxu1 }
 0x9e3   :  { %v4318_v52 = vpop.f32.mrf.mxu1 }
 0x9e5   :  { %v6391_v43 = vpop.f32.mrf.mxu0 }
 0x9e7   :  { %v4234_v48 = vpop.f32.mrf.mxu0 }
 0x9e8   :  { %6429 = vmatprep.mubr.msk.f32.mxu0 %vm527_vm1, %v4234_v48 }
 0x9e9   :  { %v6401_v56 = vpop.f32.mrf.mxu0  ;;  %6430 = vmatmul.mubr.msk.f32.vlgmr.msra.gmra.mxu0 %vm527_vm1, %v6391_v43 }
 0x9ea   :  { %6432 = vmatprep.mubr.msk.f32.mxu0 %vm527_vm1, %v4318_v52  ;;  %6444 = vmatpush3.msra.mxu0 %v4833_v18 }
 0x9eb   :  { %v4402_v58 = vpop.f32.mrf.mxu0 }
 0x9ec   :  { %6437 = vmatprep.mubr.msk.f32.mxu1 %vm527_vm1, %v4402_v58 }
 0x9ed   :  { %v6406_v59 = vpop.f32.mrf.mxu1  ;;  %6433 = vmatmul.mubr.msk.f32.gmra.mxu0 %vm527_vm1, %v6396_v42  ;;  %6438 = vmatmul.mubr.msk.f32.vlgmr.msra.gmra.mxu1 %vm527_vm1, %v6401_v56 }
 0x9ee   :  { %6452 = vmatpush3.msra.mxu1 %v4834_v45 }
 0x9ef   :  { %v4486_v60 = vpop.f32.mrf.mxu1 }
 0x9f0   :  { %6440 = vmatprep.mubr.msk.f32.mxu1 %vm527_vm1, %v4486_v60 }
 0x9f1   :  { %6441 = vmatmul.mubr.msk.f32.gmra.mxu1 %vm527_vm1, %v6406_v59 }
 0x9f2   :  { %v6416_v62 = vpop.f32.mrf.mxu1 }
 0x9f3   :  { %v6411_v0 = vpop.f32.mrf.mxu0 }
 0x9f4   :  { %v4654_v3 = vpop.f32.mrf.mxu1 }
 0x9f5   :  { %v4570_v2 = vpop.f32.mrf.mxu0 }
 0x9f6   :  { %6445 = vmatprep.mubr.msk.f32.mxu0 %vm527_vm1, %v4570_v2 }
 0x9f7   :  { %6446 = vmatmul.mubr.msk.f32.vlgmr.msra.gmra.mxu0 %vm527_vm1, %v6411_v0 }
 0x9f8   :  { %6448 = vmatprep.mubr.msk.f32.mxu0 %vm527_vm1, %v4654_v3 }
 0x9fa   :  { %v6426_v33 = vpop.f32.mrf.mxu1 }
 0x9fb   :  { %6449 = vmatmul.mubr.msk.f32.gmra.mxu0 %vm527_vm1, %v6416_v62 }
 0x9fc   :  { %v4822_v46 = vpop.f32.mrf.mxu1 }
 0x9fe   :  { %v6421_v49 = vpop.f32.mrf.mxu0 }
 0xa00   :  { %v4738_v32 = vpop.f32.mrf.mxu0 }
 0xa01   :  { %6453 = vmatprep.mubr.msk.f32.mxu1 %vm527_vm1, %v4738_v32 }
 0xa02   :  { %6454 = vmatmul.mubr.msk.f32.vlgmr.msra.gmra.mxu1 %vm527_vm1, %v6421_v49 }
 0xa03   :  { %6456 = vmatprep.mubr.msk.f32.mxu1 %vm527_vm1, %v4822_v46 }
 0xa06   :  { %6457 = vmatmul.mubr.msk.f32.gmra.mxu1 %vm527_vm1, %v6426_v33 }
 0xaa9   :  { %v6431_v1 = vpop.f32.mrf.mxu0 }
 0xaaa   :  { %v5230_v11 = vsel %vm69_vm0, %v6431_v1, 0.0 }
 0xaab   :  { %v4913_v6 = vpop.f32.mrf.mxu0 }
 0xaac   :  { %v5223_v14 = vsel %vm69_vm0, %v4913_v6, 0.0  ;;  %v5355_v6 = vld [vmem:[%s7886_s15 + $0x38] sm:$0xff] }
 0xaad   :  { %v6434_v9 = vpop.f32.mrf.mxu0  ;;  %v6439_v50 = vpop.f32.mrf.mxu1  ;;  %5404 = vmatprep.subr.mxu0 %v5355_v6  ;;  %v5508_v6 = vld [vmem:[%s7888_s17 + $0x70] sm:$0xff] }
 0xaae   :  { %v5231_v34 = vsel %vm69_vm0, %v6439_v50, 0.0  ;;  %v5244_v16 = vsel %vm69_vm0, %v6434_v9, 0.0  ;;  %v5354_v9 = vld [vmem:[%s7886_s15 + $0x30] sm:$0xff]  ;;  %v5353_v50 = vld [vmem:[%s7886_s15 + $0x28] sm:$0xff] }
 0xaaf   :  { %v4923_v47 = vpop.f32.mrf.mxu0  ;;  %v5010_v20 = vpop.f32.mrf.mxu1  ;;  %v5232_v55 = vadd.f32 %v5231_v34, %v5230_v11  ;;  %5405 = vmatpush1.msra.mxu0 %v5354_v9  ;;  %v6691_v34 = vmov 0.0   ;;  %v5507_v9 = vld [vmem:[%s7888_s17 + $0x68] sm:$0xff] }
 0xab0   :  { %v5224_v53 = vsel %vm69_vm0, %v5010_v20, 0.0  ;;  %v5237_v38 = vsel %vm69_vm0, %v4923_v47, 0.0  ;;  %5406 = vmatprep.subr.mxu0 %v5353_v50  ;;  %v5352_v47 = vld [vmem:[%s7886_s15 + $0x20] sm:$0xff]  ;;  %v5350_v20 = vld [vmem:[%s7886_s15 + $0x10] sm:$0xff]  ;;  %5444 = vmatprep.mubr.f32.mxu0 %v6691_v34 }
 0xab1   :  { %v6442_v24 = vpop.f32.mrf.mxu1  ;;  %v5225_v13 = vadd.f32 %v5224_v53, %v5223_v14  ;;  %5407 = vmatpush1.msra.mxu0 %v5352_v47  ;;  %v5506_v50 = vld [vmem:[%s7888_s17 + $0x60] sm:$0xff]  ;;  %v5505_v47 = vld [vmem:[%s7888_s17 + $0x58] sm:$0xff] }
 0xab2   :  { %v5245_v22 = vsel %vm69_vm0, %v6442_v24, 0.0  ;;  %v5348_v24 = vld [vmem:[%s7886_s15] sm:$0xff] }
 0xab3   :  { %v5020_v7 = vpop.f32.mrf.mxu1  ;;  %v5246_v26 = vadd.f32 %v5245_v22, %v5244_v16 }
 0xab4   :  { %v5238_v36 = vsel %vm69_vm0, %v5020_v7, 0.0 }
 0xab5   :  { %v5239_v29 = vadd.f32 %v5238_v36, %v5237_v38 }
 0xab7   :  { %v6447_v19 = vpop.f32.mrf.mxu0 }
 0xab8   :  { %v5233_v63 = vsel %vm69_vm0, %v6447_v19, 0.0  ;;  %v5351_v19 = vld [vmem:[%s7886_s15 + $0x18] sm:$0xff] }
 0xab9   :  { %v5107_v10 = vpop.f32.mrf.mxu0  ;;  %v5234_v35 = vadd.f32 %v5233_v63, %v5232_v55  ;;  %5408 = vmatprep.subr.mxu0 %v5351_v19  ;;  %v5504_v19 = vld [vmem:[%s7888_s17 + $0x50] sm:$0xff] }
 0xaba   :  { %v5226_v61 = vsel %vm69_vm0, %v5107_v10, 0.0  ;;  %5409 = vmatpush1.msra.mxu0 %v5350_v20  ;;  %v5349_v10 = vld [vmem:[%s7886_s15 + $0x8] sm:$0xff] }
 0xabb   :  { %v6450_v4 = vpop.f32.mrf.mxu0  ;;  %v5227_v37 = vadd.f32 %v5226_v61, %v5225_v13  ;;  %5410 = vmatprep.subr.mxu0 %v5349_v10  ;;  %v5503_v20 = vld [vmem:[%s7888_s17 + $0x48] sm:$0xff]  ;;  %v5502_v10 = vld [vmem:[%s7888_s17 + $0x40] sm:$0xff] }
 0xabc   :  { %v5247_v23 = vsel %vm69_vm0, %v6450_v4, 0.0  ;;  %5411 = vmatpush1.msra.mxu0 %v5348_v24  ;;  %v5501_v24 = vld [vmem:[%s7888_s17 + $0x38] sm:$0xff] }
 0xabd   :  { %v5117_v27 = vpop.f32.mrf.mxu0  ;;  %v5248_v39 = vadd.f32 %v5247_v23, %v5246_v26 }
 0xabe   :  { %v5240_v31 = vsel %vm69_vm0, %v5117_v27, 0.0 }
 0xabf   :  { %v5241_v21 = vadd.f32 %v5240_v31, %v5239_v29 }
 0xac2   :  { %v6455_v8 = vpop.f32.mrf.mxu1 }
 0xac3   :  { %v5235_v25 = vsel %vm69_vm0, %v6455_v8, 0.0 }
 0xac4   :  { %v5236_v54 = vadd.f32 %v5235_v25, %v5234_v35  ;;  %v5204_v12 = vpop.f32.mrf.mxu1 }
 0xac5   :  { %v5228_v17 = vsel %vm69_vm0, %v5204_v12, 0.0 }
 0xac6   :  { %v5229_v15 = vadd.f32 %v5228_v17, %v5227_v37  ;;  %v6458_v30 = vpop.f32.mrf.mxu1  ;;  %v5259_v41 = vadd.f32 %v5791_v28, %v5236_v54 }
 0xac7   :  { %v5249_v40 = vsel %vm69_vm0, %v6458_v30, 0.0 }
 0xac8   :  { %v5258_v18 = vadd.f32 %v5791_v28, %v5229_v15  ;;  %v5250_v45 = vadd.f32 %v5249_v40, %v5248_v39  ;;  %v5214_v42 = vpop.f32.mrf.mxu1  ;;  %v7740_v58 = vadd.f32 %v5259_v41, %v7283_v44  ;;  %v5792_v40 = vld [vmem:[%s7884_s13] ss:$0 sm:$0xff] }
 0xac9   :  { %v5242_v43 = vsel %vm69_vm0, %v5214_v42, 0.0 }
 0xaca   :  { %v7737_v48 = vadd.f32 %v5258_v18, %v7289_v51  ;;  %v5261_v52 = vadd.f32 %v5791_v28, %v5250_v45  ;;  %v5243_v56 = vadd.f32 %v5242_v43, %v5241_v21  ;;  %v5269_v44 = vsel %vm69_vm0, %v7740_v58, 0.0  ;;  %v5793_v18 = vld [vmem:[%s7885_s14] ss:$0 sm:$0xff] }
 0xacb   :  { %v5283_v33 = vmul.f32 %v7740_v58, %v7740_v58 }
 0xacc   :  { %v5260_v59 = vadd.f32 %v5791_v28, %v5243_v56  ;;  %v5266_v60 = vsel %vm69_vm0, %v7737_v48, 0.0  ;;  %v5282_v62 = vmul.f32 %v7737_v48, %v7737_v48  ;;  %v7747_v0 = vadd.f32 %v5261_v52, %v7296_v57 }
 0xacd   :  { %5267 = vadd.xlane.f32.xlu0 %v5266_v60 }
 0xace   :  { %v7750_v2 = vadd.f32 %v5260_v59, %v7313_v5  ;;  %v5286_v51 = vsel %vm69_vm0, %v5282_v62, 0.0  ;;  %v5285_v57 = vmul.f32 %v7747_v0, %v7747_v0  ;;  %v5289_v5 = vsel %vm69_vm0, %v5283_v33, 0.0 }
 0xacf   :  { %5287 = vadd.xlane.f32.xlu1 %v5286_v51  ;;  %v5275_v1 = vsel %vm69_vm0, %v7747_v0, 0.0 }
 0xad0   :  { %v5284_v3 = vmul.f32 %v7750_v2, %v7750_v2  ;;  %v5295_v32 = vsel %vm69_vm0, %v5285_v57, 0.0  ;;  %v5272_v46 = vsel %vm69_vm0, %v7750_v2, 0.0 }
 0xad1   :  { %5270 = vadd.xlane.f32.xlu0 %v5269_v44 }
 0xad2   :  { %v5292_v49 = vsel %vm69_vm0, %v5284_v3, 0.0 }
 0xad3   :  { %5293 = vadd.xlane.f32.xlu1 %v5292_v49 }
 0xad5   :  { %5290 = vadd.xlane.f32.xlu0 %v5289_v5 }
 0xad7   :  { %5296 = vadd.xlane.f32.xlu1 %v5295_v32 }
 0xad9   :  { %5273 = vadd.xlane.f32.xlu0 %v5272_v46 }
 0xadd   :  { %5276 = vadd.xlane.f32.xlu0 %v5275_v1  ;;  %v5509_v1 = vld [vmem:[%s7888_s17 + $0x78] sm:$0xff] }
 0xade   :  { %6459 = vmatprep.subr.mxu1 %v5509_v1 }
 0xadf   :  { %6460 = vmatpush3.msra.mxu1 %v5509_v1 }
 0xae0   :  { %6461 = vmatprep.subr.mxu1 %v5508_v6 }
 0xae1   :  { %6462 = vmatpush3.msra.mxu1 %v5508_v6 }
 0xae2   :  { %6463 = vmatprep.subr.mxu1 %v5507_v9 }
 0xae3   :  { %6464 = vmatpush3.msra.mxu1 %v5507_v9 }
 0xae4   :  { %6465 = vmatprep.subr.mxu1 %v5506_v50 }
 0xae5   :  { %6466 = vmatpush3.msra.mxu1 %v5506_v50  ;;  %v5798_v50 = vld [vmem:[%s7889_s18] ss:$0 sm:$0xff]  ;;  %s6667_s18 = scalar_lea.vmem %s5616_s1, 512 }
 0xae6   :  { %6467 = vmatprep.subr.mxu1 %v5505_v47  ;;  %p6668_p0 = scmp.ne.s32.totalorder %s5616_s1, %s6667_s18  ;;  %p6673_p2 = scmp.lt.s32.totalorder %s6667_s18, %s6667_s18 }
 0xae7   :  { %6468 = vmatpush3.msra.mxu1 %v5505_v47 }
 0xae8   :  { %6469 = vmatprep.subr.mxu1 %v5504_v19  ;;  %p6674_p3 = por %p6673_p2, %p6672_p1 }
 0xae9   :  { %6470 = vmatpush3.msra.mxu1 %v5504_v19 }
 0xaea   :  { %6471 = vmatprep.subr.mxu1 %v5503_v20  ;;  %p6675_p4 = pnand %p6674_p3, %p6668_p0 }
 0xaeb   :  { %6472 = vmatpush3.msra.mxu1 %v5503_v20 }
 0xaec   :  { %6473 = vmatprep.subr.mxu1 %v5502_v10 }
 0xaed   :  { %6474 = vmatpush3.msra.mxu1 %v5502_v10 }
 0xaee   :  { %6475 = vmatprep.subr.mxu1 %v5501_v24 }
 0xaef   :  { %6476 = vmatpush3.msra.mxu1 %v5501_v24 }
 0xb56   :  { %v5268_v4 = vpop.xlane.xlu0 %5267 }
 0xb57   :  { %v5278_v11 = vmul.f32 0.03125, %v5268_v4  ;;  %v5499_v4 = vld [vmem:[%s7888_s17 + $0x28] sm:$0xff] }
 0xb58   :  { %v5288_v53 = vpop.xlane.xlu1 %5287 }
 0xb59   :  { %v5302_v63 = vmul.f32 %v5278_v11, %v5278_v11  ;;  %v5298_v55 = vmul.f32 0.03125, %v5288_v53  ;;  %v5310_v39 = vsub.f32 %v7737_v48, %v5278_v11  ;;  %v5498_v11 = vld [vmem:[%s7888_s17 + $0x20] sm:$0xff]  ;;  %v5497_v53 = vld [vmem:[%s7888_s17 + $0x18] sm:$0xff] }
 0xb5a   :  { %v5271_v7 = vpop.xlane.xlu0 %5270 }
 0xb5b   :  { %v5306_v14 = vsub.f32 %v5298_v55, %v5302_v63  ;;  %v5279_v22 = vmul.f32 0.03125, %v5271_v7  ;;  %v5496_v63 = vld [vmem:[%s7888_s17 + $0x10] sm:$0xff]  ;;  %v5495_v55 = vld [vmem:[%s7888_s17 + $0x8] sm:$0xff]  ;;  %v5494_v7 = vld [vmem:[%s7888_s17] sm:$0xff] }
 0xb5c   :  { %v5294_v8 = vpop.xlane.xlu1 %5293 }
 0xb5d   :  { %v5314_v61 = vadd.f32 1e-05, %v5306_v14  ;;  %v5303_v35 = vmul.f32 %v5279_v22, %v5279_v22  ;;  %v5300_v26 = vmul.f32 0.03125, %v5294_v8  ;;  %v5311_v42 = vsub.f32 %v7740_v58, %v5279_v22 }
 0xb5e   :  { %v5291_v13 = vpop.xlane.xlu0 %5290  ;;  %v5358_v14 = vlaneseq }
 0xb5f   :  { %6647 = vrsqrt.f32 %v5314_v61  ;;  %v5299_v27 = vmul.f32 0.03125, %v5291_v13  ;;  %v5356_v13 = vld [vmem:[%s7887_s16] sm:$0x3] }
 0xb60   :  { %v5297_v54 = vpop.xlane.xlu1 %5296  ;;  %v5359_v22 = vshrl.u32 %v5358_v14, 7 }
 0xb61   :  { %v5307_v16 = vsub.f32 %v5299_v27, %v5303_v35  ;;  %v5301_v28 = vmul.f32 0.03125, %v5297_v54 }
 0xb62   :  { %v5274_v36 = vpop.xlane.xlu0 %5273  ;;  %v5364_v61 = vsub.s32 1, %v5359_v22 }
 0xb63   :  { %v5315_v23 = vadd.f32 1e-05, %v5307_v16  ;;  %v5280_v25 = vmul.f32 0.03125, %v5274_v36 }
 0xb64   :  { %v5365_v35 = vrot.slane %v5356_v13, %v5364_v61 }
 0xb65   :  { %6649 = vrsqrt.f32 %v5315_v23  ;;  %v5304_v37 = vmul.f32 %v5280_v25, %v5280_v25  ;;  %v5312_v60 = vsub.f32 %v7750_v2, %v5280_v25 }
 0xb66   :  { %v5277_v12 = vpop.xlane.xlu0 %5276 }
 0xb67   :  { %v5308_v38 = vsub.f32 %v5300_v26, %v5304_v37  ;;  %v5281_v31 = vmul.f32 0.03125, %v5277_v12 }
 0xb69   :  { %v5316_v17 = vadd.f32 1e-05, %v5308_v38  ;;  %v5305_v29 = vmul.f32 %v5281_v31, %v5281_v31  ;;  %v5313_v33 = vsub.f32 %v7747_v0, %v5281_v31  ;;  %v5360_v38 = vsub.s32 0, %v5359_v22 }
 0xb6b   :  { %6651 = vrsqrt.f32 %v5316_v17  ;;  %v5309_v15 = vsub.f32 %v5301_v28, %v5305_v29 }
 0xb6c   :  { %v6648_v30 = vpop.eup %6647 }
 0xb6d   :  { %v5322_v21 = vmul.f32 %v6648_v30, %v5310_v39  ;;  %v5317_v41 = vadd.f32 1e-05, %v5309_v15  ;;  %v5361_v39 = vrot.slane %v5356_v13, %v5360_v38 }
 0xb6f   :  { %v5333_v45 = vmul.f32 %v5792_v40, %v5322_v21  ;;  %6653 = vrsqrt.f32 %v5317_v41 }
 0xb71   :  { %v5344_v43 = vadd.f32 %v5793_v18, %v5333_v45 }
 0xb72   :  { %v6650_v52 = vpop.eup %6649 }
 0xb73   :  { %5794 = vmatmul.mubr.msk.f32.vlgmr.msra.gmra.mxu0 %vm69_vm0, %v5344_v43  ;;  %v5323_v56 = vmul.f32 %v6650_v52, %v5311_v42 }
 0xb74   :  { %5450 = vmatprep.mubr.f32.mxu0 %v6691_v34 }
 0xb75   :  { %v5334_v59 = vmul.f32 %v5792_v40, %v5323_v56 }
 0xb77   :  { %v5345_v62 = vadd.f32 %v5793_v18, %v5334_v59 }
 0xb78   :  { %v6652_v51 = vpop.eup %6651 }
 0xb79   :  { %v5324_v44 = vmul.f32 %v6652_v51, %v5312_v60  ;;  %5795 = vmatmul.mubr.msk.f32.gmra.mxu0 %vm69_vm0, %v5345_v62 }
 0xb7a   :  { %5456 = vmatprep.mubr.f32.mxu0 %v6691_v34 }
 0xb7b   :  { %v5335_v3 = vmul.f32 %v5792_v40, %v5324_v44 }
 0xb7c   :  { %v6654_v49 = vpop.eup %6653 }
 0xb7d   :  { %v5325_v57 = vmul.f32 %v6654_v49, %v5313_v33  ;;  %v5346_v5 = vadd.f32 %v5793_v18, %v5335_v3 }
 0xb7f   :  { %v5336_v32 = vmul.f32 %v5792_v40, %v5325_v57  ;;  %5796 = vmatmul.mubr.msk.f32.gmra.mxu0 %vm69_vm0, %v5346_v5 }
 0xb80   :  { %5462 = vmatprep.mubr.f32.mxu0 %v6691_v34  ;;  %v5500_v34 = vld [vmem:[%s7888_s17 + $0x30] sm:$0xff] }
 0xb81   :  { %v5347_v46 = vadd.f32 %v5793_v18, %v5336_v32  ;;  %6477 = vmatprep.subr.mxu1 %v5500_v34 }
 0xb82   :  { %6478 = vmatpush3.msra.mxu1 %v5500_v34 }
 0xb83   :  { %5797 = vmatmul.mubr.msk.f32.gmra.mxu0 %vm69_vm0, %v5347_v46  ;;  %6479 = vmatprep.subr.mxu1 %v5499_v4 }
 0xb84   :  { %6480 = vmatpush3.msra.mxu1 %v5499_v4 }
 0xb85   :  { %6481 = vmatprep.subr.mxu1 %v5498_v11 }
 0xb86   :  { %6482 = vmatpush3.msra.mxu1 %v5498_v11 }
 0xb87   :  { %6483 = vmatprep.subr.mxu1 %v5497_v53 }
 0xb88   :  { %6484 = vmatpush3.msra.mxu1 %v5497_v53 }
 0xb89   :  { %6485 = vmatprep.subr.mxu1 %v5496_v63 }
 0xb8a   :  { %6486 = vmatpush3.msra.mxu1 %v5496_v63 }
 0xb8b   :  { %6487 = vmatprep.subr.mxu1 %v5495_v55 }
 0xb8c   :  { %6488 = vmatpush3.msra.mxu1 %v5495_v55 }
 0xb8d   :  { %6489 = vmatprep.subr.mxu1 %v5494_v7 }
 0xb8e   :  { %6490 = vmatpush3.msra.mxu1 %v5494_v7 }
 0xc33   :  { %v5446_v27 = vpop.f32.mrf.mxu0 }
 0xc34   :  { %v5447_v18 = vadd.f32 %v5446_v27, %v5361_v39 }
 0xc35   :  { %v5448_v8 = vpop.f32.mrf.mxu0 }
 0xc36   :  { %v5449_v16 = vadd.f32 %v5448_v8, %v5365_v35 }
 0xc38   :  { %v5474_v36 = vmul.f32 0.70710677, %v5449_v16  ;;  %v5469_v40 = vmul.f32 0.5, %v5449_v16 }
 0xc39   :  { %v5452_v23 = vpop.f32.mrf.mxu0 }
 0xc3a   :  { %6655 = verf.f32 %v5474_v36  ;;  %v5453_v59 = vadd.f32 %v5452_v23, %v5361_v39 }
 0xc3b   :  { %v5454_v25 = vpop.f32.mrf.mxu0 }
 0xc3c   :  { %v5455_v26 = vadd.f32 %v5454_v25, %v5365_v35 }
 0xc3e   :  { %v5475_v37 = vmul.f32 0.70710677, %v5455_v26  ;;  %v5470_v52 = vmul.f32 0.5, %v5455_v26 }
 0xc3f   :  { %v5458_v54 = vpop.f32.mrf.mxu0 }
 0xc40   :  { %6657 = verf.f32 %v5475_v37  ;;  %v5459_v33 = vadd.f32 %v5458_v54, %v5361_v39 }
 0xc41   :  { %v5460_v12 = vpop.f32.mrf.mxu0 }
 0xc42   :  { %v5461_v31 = vadd.f32 %v5460_v12, %v5365_v35 }
 0xc43   :  { %v5464_v28 = vpop.f32.mrf.mxu0 }
 0xc44   :  { %v5476_v17 = vmul.f32 0.70710677, %v5461_v31  ;;  %v5471_v44 = vmul.f32 0.5, %v5461_v31  ;;  %v5465_v1 = vadd.f32 %v5464_v28, %v5361_v39 }
 0xc45   :  { %v5466_v29 = vpop.f32.mrf.mxu0 }
 0xc46   :  { %6659 = verf.f32 %v5476_v17  ;;  %v5467_v15 = vadd.f32 %v5466_v29, %v5365_v35 }
 0xc47   :  { %v6656_v30 = vpop.eup %6655 }
 0xc48   :  { %v5482_v21 = vadd.f32 1.0, %v6656_v30  ;;  %v5477_v41 = vmul.f32 0.70710677, %v5467_v15  ;;  %v5472_v5 = vmul.f32 0.5, %v5467_v15 }
 0xc4a   :  { %v5486_v45 = vmul.f32 %v5482_v21, %v5469_v40  ;;  %6661 = verf.f32 %v5477_v41 }
 0xc4c   :  { %v5490_v42 = vmul.f32 %v5486_v45, %v5447_v18 }
 0xc4d   :  { %v6658_v43 = vpop.eup %6657 }
 0xc4e   :  { %v5483_v56 = vadd.f32 1.0, %v6658_v43  ;;  %6491 = vmatprep.mubr.f32.mxu1 %v5490_v42 }
 0xc50   :  { %v5487_v60 = vmul.f32 %v5483_v56, %v5470_v52 }
 0xc52   :  { %v5491_v62 = vmul.f32 %v5487_v60, %v5453_v59 }
 0xc53   :  { %v6660_v51 = vpop.eup %6659 }
 0xc54   :  { %v5484_v3 = vadd.f32 1.0, %v6660_v51  ;;  %6492 = vmatmul.mubr.f32.vlgmr.msra.gmra.mxu1 %v5491_v62 }
 0xc56   :  { %v5488_v49 = vmul.f32 %v5484_v3, %v5471_v44 }
 0xc57   :  { %v6662_v57 = vpop.eup %6661 }
 0xc58   :  { %v5485_v32 = vadd.f32 1.0, %v6662_v57  ;;  %v5492_v46 = vmul.f32 %v5488_v49, %v5459_v33 }
 0xc5a   :  { %v5489_v6 = vmul.f32 %v5485_v32, %v5472_v5  ;;  %6494 = vmatprep.mubr.f32.mxu1 %v5492_v46 }
 0xc5c   :  { %v5493_v9 = vmul.f32 %v5489_v6, %v5465_v1 }
 0xc5e   :  { %6495 = vmatmul.mubr.f32.gmra.mxu1 %v5493_v9 }
 0xd14   :  { %v6493_v47 = vpop.f32.mrf.mxu1 }
 0xd15   :  { %v5589_v19 = vadd.f32 %v6493_v47, %v5798_v50 }
 0xd16   :  { %v5583_v20 = vpop.f32.mrf.mxu1 }
 0xd17   :  { %v5603_v10 = vadd.f32 %v5589_v19, %v7740_v58  ;;  %v5584_v24 = vadd.f32 %v5798_v50, %v5583_v20 }
 0xd19   :  { %5607 = vst.msk [vmem:[#allocation2 + $0x8] sm:$0xff] %vm69_vm0, %v5603_v10  ;;  %v5602_v34 = vadd.f32 %v5584_v24, %v7737_v48 }
 0xd1b   :  { %5606 = vst.msk [vmem:[#allocation2] sm:$0xff] %vm69_vm0, %v5602_v34 }
 0xd1e   :  { %v6496_v4 = vpop.f32.mrf.mxu1 }
 0xd1f   :  { %v5599_v11 = vadd.f32 %v6496_v4, %v5798_v50 }
 0xd20   :  { %v5593_v53 = vpop.f32.mrf.mxu1 }
 0xd21   :  { %v5605_v63 = vadd.f32 %v5599_v11, %v7747_v0  ;;  %v5594_v55 = vadd.f32 %v5798_v50, %v5593_v53 }
 0xd23   :  { %5609 = vst.msk [vmem:[#allocation2 + $0x18] sm:$0xff] %vm69_vm0, %v5605_v63  ;;  %v5604_v7 = vadd.f32 %v5594_v55, %v7750_v2 }
 0xd25   :  { %5608 = vst.msk [vmem:[#allocation2 + $0x10] sm:$0xff] %vm69_vm0, %v5604_v7 }
 0xd26   :  { %6678 = shalt.err (!%p6675_p4)
}
 0xd27   :  { %s6693_s4 = smov 128   ;;  %s6694_s2 = smov 8  }
 0xd28   :  { %5621 = dma.vmem_to_hbm [thread:$0]  %s5616_s1, 512, %s7890_s19, [#allocation3], %s6693_s4, %s6693_s4, %s6694_s2  }
 0xd29   :  { %6687 = dma.done.wait [#allocation3], 512  }
 0xd2a   :  { %6688 = vsyncadd [#allocation3], 4294966784 }
 0xd2b   :  { %5625 = vsyncpa [#allocation3], 1 }

</bundles_post_ra>
